<compile_context>
chip_gen: v7x
topology: tpu7x:2x2x1
jax: 0.10.0
libtpu: 0.0.40
codegen_flags: <defaults>
</compile_context>

<pallas_src>
import functools

import jax
import jax.numpy as jnp
from jax.experimental import pallas as pl
from jax.experimental.pallas import tpu as pltpu

EPS = 1e-5


# ----------------------------- shared math ---------------------------------------

def _layernorm(x, w, b):
    """LayerNorm over the last dim, f32. w/b broadcast over leading dims."""
    mu = jnp.mean(x, axis=-1, keepdims=True)
    var = jnp.mean(jnp.square(x - mu), axis=-1, keepdims=True)
    return (x - mu) * jax.lax.rsqrt(var + EPS) * w + b


# ----------------------------- fused Pallas kernel --------------------------------

def _encoder_stack_kernel(nhead, num_layers, has_norm,
                          x_ref, wqkv_ref, bqkv_ref, wo_ref, bo_ref,
                          w1_ref, b1_ref, w2_ref, b2_ref,
                          n1w_ref, n1b_ref, n2w_ref, n2b_ref,
                          fnw_ref, fnb_ref,
                          out_ref, h_ref):
    """Grid = (batch_block, layer).  One encoder layer per grid step; the running
    activation for the current Bblk batch elements stays resident in the VMEM scratch
    `h_ref` across the (inner, 'arbitrary') layer axis."""
    l = pl.program_id(1)
    Bb, T, E = h_ref.shape
    H = nhead
    Dh = E // H
    f32 = jnp.float32
    bf16 = jnp.bfloat16

    # Load the input activation once per batch block (layer 0 only).
    @pl.when(l == 0)
    def _():
        h_ref[...] = x_ref[...].astype(f32)

    x = h_ref[...]                                            # (Bb, T, E) f32 residual

    # ---- self-attention ---------------------------------------------------------
    # Fused QKV: a single lane-dense (Bb*T, E) @ (E, 3E) GEMM (full-width MXU).
    # 1/sqrt(Dh) is already folded into the Q columns / bias host-side.
    x2 = x.reshape(Bb * T, E).astype(bf16)
    qkv = jnp.dot(x2, wqkv_ref[...],
                  preferred_element_type=f32) + bqkv_ref[...]          # (Bb*T, 3E)

    # Per-head score / PV einsums (inherently Dh-contracted); heads come from cheap
    # static lane slices of the fused GEMM output, batch dim stays leading.
    ctx_heads = []
    for h in range(H):
        q_h = qkv[:, h * Dh:(h + 1) * Dh].reshape(Bb, T, Dh)
        k_h = qkv[:, E + h * Dh:E + (h + 1) * Dh].reshape(Bb, T, Dh)
        v_h = qkv[:, 2 * E + h * Dh:2 * E + (h + 1) * Dh].reshape(Bb, T, Dh)

        s = jnp.einsum('btd,bsd->bts', q_h.astype(bf16), k_h.astype(bf16),
                       preferred_element_type=f32)                     # (Bb, T, T)
        s = s - jnp.max(s, axis=-1, keepdims=True)
        p = jnp.exp(s)
        denom = jnp.sum(p, axis=-1, keepdims=True)                     # (Bb, T, 1)
        ctx_h = jnp.einsum('bts,bsd->btd', p.astype(bf16), v_h.astype(bf16),
                           preferred_element_type=f32)                 # (Bb, T, Dh)
        # Normalize after PV: an (T, Dh) multiply instead of an (T, T) one.
        ctx_heads.append(ctx_h * (1.0 / denom))

    # Head "concat" along lanes + single (Bb*T, E) @ (E, E) output projection.
    ctx = jnp.concatenate(ctx_heads, axis=-1).reshape(Bb * T, E)
    attn = jnp.dot(ctx.astype(bf16), wo_ref[...],
                   preferred_element_type=f32) + bo_ref[...]           # (Bb*T, E)
    x = _layernorm(x + attn.reshape(Bb, T, E), n1w_ref[...], n1b_ref[...])

    # ---- feed-forward (ReLU) + add & norm ----------------------------------------
    x2 = x.reshape(Bb * T, E).astype(bf16)
    hid = jnp.maximum(jnp.dot(x2, w1_ref[...],
                              preferred_element_type=f32) + b1_ref[...], 0.0)
    ff = jnp.dot(hid.astype(bf16), w2_ref[...],
                 preferred_element_type=f32) + b2_ref[...]
    x = _layernorm(x + ff.reshape(Bb, T, E), n2w_ref[...], n2b_ref[...])

    h_ref[...] = x

    # Final (optional) LayerNorm folded into the last layer; single HBM writeback
    # (output index_map is layer-invariant, so the block stays VMEM-resident).
    @pl.when(l == num_layers - 1)
    def _():
        y = h_ref[...]
        if has_norm:
            y = _layernorm(y, fnw_ref[...], fnb_ref[...])
        out_ref[...] = y.astype(out_ref.dtype)


# ----------------------------- host-side weight prep ------------------------------

def _prep_layer_weights(layer_params, nhead):
    """Stack per-layer params with a leading layer axis, fuse Q/K/V into one lane-dense
    (E, 3E) weight, fold the 1/sqrt(Dh) scale into Q, pad dff to a multiple of 128.
    Matmul weights are cast to bf16 (MXU operands); biases / norm params stay f32."""
    L = len(layer_params)

    def stk(i):
        return jnp.stack([lp[i] for lp in layer_params], axis=0)

    (wq, bq, wk, bk, wv, bv, wo, bo,
     w1, b1, w2, b2, n1w, n1b, n2w, n2b) = (stk(i) for i in range(16))

    E = wq.shape[-1]
    Dh = E // nhead
    scale = 1.0 / (Dh ** 0.5)

    # Fold the attention scale into the Q projection (weights AND bias).
    wq = wq * scale
    bq = bq * scale

    # Fused QKV: columns ordered [q | k | v], each head-major (col = h*Dh + d).
    wqkv = jnp.concatenate([wq, wk, wv], axis=-1)           # (L, E, 3E)
    bqkv = jnp.concatenate([bq, bk, bv], axis=-1)           # (L, 1, 3E)

    # FFN: pad dff to a lane-dense multiple of 128 (zero pad -> relu(0)=0 -> no-op).
    dff = w1.shape[-1]
    dffp = ((dff + 127) // 128) * 128
    if dffp != dff:
        pad = dffp - dff
        w1 = jnp.pad(w1, ((0, 0), (0, 0), (0, pad)))
        b1 = jnp.pad(b1, ((0, 0), (0, 0), (0, pad)))
        w2 = jnp.pad(w2, ((0, 0), (0, pad), (0, 0)))

    bf = lambda a: a.astype(jnp.bfloat16)
    f32 = lambda a: a.astype(jnp.float32)
    return [bf(wqkv), f32(bqkv),
            bf(wo), f32(bo),
            bf(w1), f32(b1),
            bf(w2), f32(b2),
            f32(n1w), f32(n1b), f32(n2w), f32(n2b)]


# ----------------------------- wrapper --------------------------------------------

def transformer_encoder(src, layer_params, norm_params, nhead, b_block=4):
    """src: (S, B, E) -- PyTorch seq-first convention (batch_first=False)."""
    S, B, E = src.shape
    L = len(layer_params)

    b_block = max(1, min(b_block, B))
    n_bblk = -(-B // b_block)
    B_pad = n_bblk * b_block

    # One-time layout change to batch-leading; the batch-block dim becomes the
    # 'parallel' grid axis (sharded across the 2 TensorCores on v7x).
    x = jnp.transpose(src, (1, 0, 2))                          # (B, S, E)
    if B_pad != B:
        x = jnp.concatenate([x, jnp.zeros((B_pad - B, S, E), x.dtype)], axis=0)

    stacked = _prep_layer_weights(layer_params, nhead)
    dffp = stacked[4].shape[-1]

    has_norm = norm_params is not None
    if has_norm:
        fnw = norm_params[0].reshape(1, E).astype(jnp.float32)
        fnb = norm_params[1].reshape(1, E).astype(jnp.float32)
    else:
        fnw = jnp.ones((1, E), jnp.float32)
        fnb = jnp.zeros((1, E), jnp.float32)

    def act_map(b, l):                 # activation block: per batch block, layer-invariant
        return (b, 0, 0)

    def layer_map(ndim):               # weight slab for layer l
        def m(b, l):
            return (l,) + (0,) * (ndim - 1)
        return m

    def const_map(b, l):               # final-norm params
        return (0, 0)

    in_specs = [pl.BlockSpec((b_block, S, E), act_map)]
    for a in stacked:
        in_specs.append(pl.BlockSpec((None,) + a.shape[1:], layer_map(a.ndim)))
    in_specs += [pl.BlockSpec((1, E), const_map), pl.BlockSpec((1, E), const_map)]

    # VMEM budget per generation (v7x has 64 MiB/TC vs 128 MiB on v5e/v6e).
    try:
        vmem_cap = int(pltpu.get_tpu_info().vmem_capacity_bytes)
    except Exception:
        vmem_cap = 64 * 1024 * 1024
    vmem_limit = max(32 * 1024 * 1024, min(vmem_cap * 3 // 4, 100 * 1024 * 1024))

    # Cost estimate: weights are re-streamed once per batch block; activations are
    # read once and written once (they stay VMEM-resident across the layer axis).
    weight_bytes = sum(int(a.size) * a.dtype.itemsize for a in stacked) \
        + (int(fnw.size) + int(fnb.size)) * 4
    bytes_accessed = int(n_bblk * weight_bytes
                         + int(x.size) * x.dtype.itemsize
                         + B_pad * S * E * jnp.dtype(src.dtype).itemsize)
    flops = int(2 * B_pad * S * L * (4 * E * E + 2 * S * E + 2 * E * dffp))
    transcendentals = int(B_pad * L * (nhead * S * S + 4 * S))

    out = pl.pallas_call(
        functools.partial(_encoder_stack_kernel, nhead, L, has_norm),
        out_shape=jax.ShapeDtypeStruct((B_pad, S, E), src.dtype),
        grid=(n_bblk, L),
        in_specs=in_specs,
        out_specs=pl.BlockSpec((b_block, S, E), act_map),
        scratch_shapes=[pltpu.VMEM((b_block, S, E), jnp.float32)],
        compiler_params=pltpu.CompilerParams(
            dimension_semantics=("parallel", "arbitrary"),
            vmem_limit_bytes=vmem_limit),
        cost_estimate=pl.CostEstimate(flops=flops,
                                      transcendentals=transcendentals,
                                      bytes_accessed=bytes_accessed),
    )(x, *stacked, fnw, fnb)

    out = out[:B]
    return jnp.transpose(out, (1, 0, 2))                       # back to (S, B, E)


# ----------------------------- pure-JAX reference ----------------------------------

def transformer_encoder_ref(src, layer_params, norm_params, nhead):
    S, B, E = src.shape
    Dh = E // nhead
    x = jnp.transpose(src, (1, 0, 2)).astype(jnp.float32)      # (B, S, E)
    for (wq, bq, wk, bk, wv, bv, wo, bo,
         w1, b1, w2, b2, n1w, n1b, n2w, n2b) in layer_params:
        x2 = x.reshape(B * S, E)
        q = (x2 @ wq + bq).reshape(B, S, nhead, Dh)
        k = (x2 @ wk + bk).reshape(B, S, nhead, Dh)
        v = (x2 @ wv + bv).reshape(B, S, nhead, Dh)
        s = jnp.einsum('bthd,bshd->bhts', q, k) / (Dh ** 0.5)
        p = jax.nn.softmax(s, axis=-1)
        o = jnp.einsum('bhts,bshd->bthd', p, v).reshape(B * S, E)
        attn = o @ wo + bo
        x2 = _layernorm(x2 + attn, n1w, n1b)
        h = jnp.maximum(x2 @ w1 + b1, 0.0)
        ff = h @ w2 + b2
        x2 = _layernorm(x2 + ff, n2w, n2b)
        x = x2.reshape(B, S, E)
    if norm_params is not None:
        x = _layernorm(x, norm_params[0], norm_params[1])
    return jnp.transpose(x, (1, 0, 2))


# ----------------------------- deterministic init ----------------------------------

def init_params(key, num_layers, d_model, dff):
    layers = []
    lim = 1.0 / (d_model ** 0.5)
    lim2 = 1.0 / (dff ** 0.5)

    def u(k, shape, l):
        return jax.random.uniform(k, shape, jnp.float32, -l, l)

    for _ in range(num_layers):
        key, *ks = jax.random.split(key, 13)
        p = (
            u(ks[0], (d_model, d_model), lim), u(ks[1], (1, d_model), lim),    # wq, bq
            u(ks[2], (d_model, d_model), lim), u(ks[3], (1, d_model), lim),    # wk, bk
            u(ks[4], (d_model, d_model), lim), u(ks[5], (1, d_model), lim),    # wv, bv
            u(ks[6], (d_model, d_model), lim), u(ks[7], (1, d_model), lim),    # wo, bo
            u(ks[8], (d_model, dff), lim), u(ks[9], (1, dff), lim),            # w1, b1
            u(ks[10], (dff, d_model), lim2), u(ks[11], (1, d_model), lim2),    # w2, b2
            jnp.ones((1, d_model), jnp.float32), jnp.zeros((1, d_model), jnp.float32),
            jnp.ones((1, d_model), jnp.float32), jnp.zeros((1, d_model), jnp.float32),
        )
        layers.append(p)
    norm = (jnp.ones((1, d_model), jnp.float32),
            jnp.zeros((1, d_model), jnp.float32))
    return layers, norm


# ----------------------------------- main -------------------------------------------

if __name__ == "__main__":
    # Small but TPU-friendly shapes: S multiple of 8, d_model / dff multiples of 128
    # (lane-dense loads/stores and unmasked output vst).
    S, B = 16, 2
    d_model, nhead, dff, num_layers = 128, 4, 256, 2

    key = jax.random.PRNGKey(0)
    key, ksrc, kparam = jax.random.split(key, 3)
    src = jax.random.normal(ksrc, (S, B, d_model), jnp.float32)
    layer_params, norm_params = init_params(kparam, num_layers, d_model, dff)

    out = jax.block_until_ready(
        transformer_encoder(src, layer_params, norm_params, nhead))
    assert out.shape == (S, B, d_model), out.shape

    ref = jax.block_until_ready(
        transformer_encoder_ref(src, layer_params, norm_params, nhead))
    max_err = float(jnp.max(jnp.abs(out - ref)))
    # bf16 MXU operands vs. a pure-f32 reference -> loose tolerance.
    assert max_err < 5e-2, max_err

    print("KERNEL_OK")
</pallas_src>

<mosaic_0001>
module attributes {stable_mosaic.version = 11 : i64} {
  func.func @_encoder_stack_kernel(%arg0: i32, %arg1: i32, %arg2: memref<2x16x128xf32, #tpu.memory_space<vmem>>, %arg3: memref<1x128x384xbf16, #tpu.memory_space<vmem>>, %arg4: memref<1x1x384xf32, #tpu.memory_space<vmem>>, %arg5: memref<1x128x128xbf16, #tpu.memory_space<vmem>>, %arg6: memref<1x1x128xf32, #tpu.memory_space<vmem>>, %arg7: memref<1x128x256xbf16, #tpu.memory_space<vmem>>, %arg8: memref<1x1x256xf32, #tpu.memory_space<vmem>>, %arg9: memref<1x256x128xbf16, #tpu.memory_space<vmem>>, %arg10: memref<1x1x128xf32, #tpu.memory_space<vmem>>, %arg11: memref<1x1x128xf32, #tpu.memory_space<vmem>>, %arg12: memref<1x1x128xf32, #tpu.memory_space<vmem>>, %arg13: memref<1x1x128xf32, #tpu.memory_space<vmem>>, %arg14: memref<1x1x128xf32, #tpu.memory_space<vmem>>, %arg15: memref<1x128xf32, #tpu.memory_space<vmem>>, %arg16: memref<1x128xf32, #tpu.memory_space<vmem>>, %arg17: memref<2x16x128xf32, #tpu.memory_space<vmem>>, %arg18: memref<2x16x128xf32, #tpu.memory_space<vmem>>) attributes {dimension_semantics = [#tpu.dimension_semantics<parallel>, #tpu.dimension_semantics<arbitrary>], iteration_bounds = array<i64: 1, 2>, scalar_prefetch = 0 : i64, scratch_operands = 1 : i64, tpu.core_type = #tpu.core_type<tc>, window_params = [{transform_indices = @transform_0, window_bounds = array<i64: 2, 16, 128>}, {transform_indices = @transform_1, window_bounds = array<i64: 1, 128, 384>}, {transform_indices = @transform_2, window_bounds = array<i64: 1, 1, 384>}, {transform_indices = @transform_3, window_bounds = array<i64: 1, 128, 128>}, {transform_indices = @transform_4, window_bounds = array<i64: 1, 1, 128>}, {transform_indices = @transform_5, window_bounds = array<i64: 1, 128, 256>}, {transform_indices = @transform_6, window_bounds = array<i64: 1, 1, 256>}, {transform_indices = @transform_7, window_bounds = array<i64: 1, 256, 128>}, {transform_indices = @transform_8, window_bounds = array<i64: 1, 1, 128>}, {transform_indices = @transform_9, window_bounds = array<i64: 1, 1, 128>}, {transform_indices = @transform_10, window_bounds = array<i64: 1, 1, 128>}, {transform_indices = @transform_11, window_bounds = array<i64: 1, 1, 128>}, {transform_indices = @transform_12, window_bounds = array<i64: 1, 1, 128>}, {pipeline_mode = #tpu.pipeline_mode<synchronous>, transform_indices = @transform_13, window_bounds = array<i64: 1, 128>}, {pipeline_mode = #tpu.pipeline_mode<synchronous>, transform_indices = @transform_14, window_bounds = array<i64: 1, 128>}, {transform_indices = @transform_15, window_bounds = array<i64: 2, 16, 128>}]} {
    %c0_i32 = arith.constant 0 : i32
    %0 = arith.cmpi eq, %arg1, %c0_i32 : i32
    %1 = arith.extui %0 : i1 to i32
    %c0_i32_0 = arith.constant 0 : i32
    %2 = arith.cmpi ne, %1, %c0_i32_0 : i32
    scf.if %2 {
      %c0_77 = arith.constant 0 : index
      %c0_78 = arith.constant 0 : index
      %c0_79 = arith.constant 0 : index
      %198 = vector.load %arg2[%c0_77, %c0_78, %c0_79] : memref<2x16x128xf32, #tpu.memory_space<vmem>>, vector<2x16x128xf32>
      %c0_80 = arith.constant 0 : index
      %c0_81 = arith.constant 0 : index
      %c0_82 = arith.constant 0 : index
      %199 = vector.load %arg18[%c0_80, %c0_81, %c0_82] : memref<2x16x128xf32, #tpu.memory_space<vmem>>, vector<2x16x128xf32>
      tpu.vector_store %arg18[%c0_80, %c0_81, %c0_82], %198 {strides = array<i32>} : memref<2x16x128xf32, #tpu.memory_space<vmem>>, vector<2x16x128xf32>,
    } else {
    }
    %c0 = arith.constant 0 : index
    %c0_1 = arith.constant 0 : index
    %c0_2 = arith.constant 0 : index
    %3 = vector.load %arg18[%c0, %c0_1, %c0_2] : memref<2x16x128xf32, #tpu.memory_space<vmem>>, vector<2x16x128xf32>
    %4 = vector.shape_cast %3 : vector<2x16x128xf32> to vector<32x128xf32>
    %5 = arith.truncf %4 : vector<32x128xf32> to vector<32x128xbf16>
    %c0_3 = arith.constant 0 : index
    %c0_4 = arith.constant 0 : index
    %c0_5 = arith.constant 0 : index
    %6 = vector.load %arg3[%c0_3, %c0_4, %c0_5] : memref<1x128x384xbf16, #tpu.memory_space<vmem>>, vector<1x128x384xbf16>
    %7 = vector.shape_cast %6 : vector<1x128x384xbf16> to vector<128x384xbf16>
    %cst = arith.constant dense<0.000000e+00> : vector<32x384xf32>
    %8 = tpu.matmul %5, %7, %cst {dimension_numbers = #tpu.dot_dimension_numbers<[1], [0], [0], [1], [0, 0, 1, 1], [], []>} : vector<32x128xbf16>, vector<128x384xbf16>, vector<32x384xf32> -> vector<32x384xf32>
    %c0_6 = arith.constant 0 : index
    %c0_7 = arith.constant 0 : index
    %c0_8 = arith.constant 0 : index
    %9 = vector.load %arg4[%c0_6, %c0_7, %c0_8] : memref<1x1x384xf32, #tpu.memory_space<vmem>>, vector<1x1x384xf32>
    %10 = vector.shape_cast %9 : vector<1x1x384xf32> to vector<1x384xf32>
    %11 = vector.broadcast %10 : vector<1x384xf32> to vector<32x384xf32>
    %12 = arith.addf %8, %11 : vector<32x384xf32>
    %13 = vector.extract_strided_slice %12 {offsets = [0, 0], sizes = [32, 32], strides = [1, 1]} : vector<32x384xf32> to vector<32x32xf32>
    %14 = vector.shape_cast %13 : vector<32x32xf32> to vector<2x16x32xf32>
    %15 = vector.extract_strided_slice %12 {offsets = [0, 128], sizes = [32, 32], strides = [1, 1]} : vector<32x384xf32> to vector<32x32xf32>
    %16 = vector.shape_cast %15 : vector<32x32xf32> to vector<2x16x32xf32>
    %17 = vector.extract_strided_slice %12 {offsets = [0, 256], sizes = [32, 32], strides = [1, 1]} : vector<32x384xf32> to vector<32x32xf32>
    %18 = vector.shape_cast %17 : vector<32x32xf32> to vector<2x16x32xf32>
    %19 = arith.truncf %14 : vector<2x16x32xf32> to vector<2x16x32xbf16>
    %20 = arith.truncf %16 : vector<2x16x32xf32> to vector<2x16x32xbf16>
    "tpu.trace_start"() <{level = 10 : i32, message = "btd,bsd->bts"}> : () -> ()
    %cst_9 = arith.constant dense<0.000000e+00> : vector<2x16x16xf32>
    %21 = tpu.matmul %19, %20, %cst_9 {dimension_numbers = #tpu.dot_dimension_numbers<[2], [2], [1], [1], [0, 0, 0, 1, 1, 1], [0], [0]>} : vector<2x16x32xbf16>, vector<2x16x32xbf16>, vector<2x16x16xf32> -> vector<2x16x16xf32>
    "tpu.trace_stop"() : () -> ()
    %cst_10 = arith.constant dense<0xFF800000> : vector<2x16xf32>
    %22 = vector.multi_reduction <maximumf>, %21, %cst_10 [2] : vector<2x16x16xf32> to vector<2x16xf32>
    %23 = vector.shape_cast %22 : vector<2x16xf32> to vector<2x16x1xf32>
    %24 = vector.broadcast %23 : vector<2x16x1xf32> to vector<2x16x16xf32>
    %25 = arith.subf %21, %24 : vector<2x16x16xf32>
    %26 = math.exp %25 : vector<2x16x16xf32>
    %cst_11 = arith.constant dense<0.000000e+00> : vector<2x16xf32>
    %27 = vector.multi_reduction <add>, %26, %cst_11 [2] : vector<2x16x16xf32> to vector<2x16xf32>
    %28 = vector.shape_cast %27 : vector<2x16xf32> to vector<2x16x1xf32>
    %29 = arith.truncf %26 : vector<2x16x16xf32> to vector<2x16x16xbf16>
    %30 = arith.truncf %18 : vector<2x16x32xf32> to vector<2x16x32xbf16>
    "tpu.trace_start"() <{level = 10 : i32, message = "bts,bsd->btd"}> : () -> ()
    %cst_12 = arith.constant dense<0.000000e+00> : vector<2x16x32xf32>
    %31 = tpu.matmul %29, %30, %cst_12 {dimension_numbers = #tpu.dot_dimension_numbers<[2], [1], [1], [2], [0, 0, 0, 1, 1, 2], [0], [0]>} : vector<2x16x16xbf16>, vector<2x16x32xbf16>, vector<2x16x32xf32> -> vector<2x16x32xf32>
    "tpu.trace_stop"() : () -> ()
    %cst_13 = arith.constant 1.000000e+00 : f32
    %32 = vector.broadcast %cst_13 : f32 to vector<2x16x1xf32>
    %33 = arith.divf %32, %28 : vector<2x16x1xf32>
    %34 = vector.broadcast %33 : vector<2x16x1xf32> to vector<2x16x32xf32>
    %35 = arith.mulf %31, %34 : vector<2x16x32xf32>
    %36 = vector.extract_strided_slice %12 {offsets = [0, 32], sizes = [32, 32], strides = [1, 1]} : vector<32x384xf32> to vector<32x32xf32>
    %37 = vector.shape_cast %36 : vector<32x32xf32> to vector<2x16x32xf32>
    %38 = vector.extract_strided_slice %12 {offsets = [0, 160], sizes = [32, 32], strides = [1, 1]} : vector<32x384xf32> to vector<32x32xf32>
    %39 = vector.shape_cast %38 : vector<32x32xf32> to vector<2x16x32xf32>
    %40 = vector.extract_strided_slice %12 {offsets = [0, 288], sizes = [32, 32], strides = [1, 1]} : vector<32x384xf32> to vector<32x32xf32>
    %41 = vector.shape_cast %40 : vector<32x32xf32> to vector<2x16x32xf32>
    %42 = arith.truncf %37 : vector<2x16x32xf32> to vector<2x16x32xbf16>
    %43 = arith.truncf %39 : vector<2x16x32xf32> to vector<2x16x32xbf16>
    "tpu.trace_start"() <{level = 10 : i32, message = "btd,bsd->bts"}> : () -> ()
    %cst_14 = arith.constant dense<0.000000e+00> : vector<2x16x16xf32>
    %44 = tpu.matmul %42, %43, %cst_14 {dimension_numbers = #tpu.dot_dimension_numbers<[2], [2], [1], [1], [0, 0, 0, 1, 1, 1], [0], [0]>} : vector<2x16x32xbf16>, vector<2x16x32xbf16>, vector<2x16x16xf32> -> vector<2x16x16xf32>
    "tpu.trace_stop"() : () -> ()
    %cst_15 = arith.constant dense<0xFF800000> : vector<2x16xf32>
    %45 = vector.multi_reduction <maximumf>, %44, %cst_15 [2] : vector<2x16x16xf32> to vector<2x16xf32>
    %46 = vector.shape_cast %45 : vector<2x16xf32> to vector<2x16x1xf32>
    %47 = vector.broadcast %46 : vector<2x16x1xf32> to vector<2x16x16xf32>
    %48 = arith.subf %44, %47 : vector<2x16x16xf32>
    %49 = math.exp %48 : vector<2x16x16xf32>
    %cst_16 = arith.constant dense<0.000000e+00> : vector<2x16xf32>
    %50 = vector.multi_reduction <add>, %49, %cst_16 [2] : vector<2x16x16xf32> to vector<2x16xf32>
    %51 = vector.shape_cast %50 : vector<2x16xf32> to vector<2x16x1xf32>
    %52 = arith.truncf %49 : vector<2x16x16xf32> to vector<2x16x16xbf16>
    %53 = arith.truncf %41 : vector<2x16x32xf32> to vector<2x16x32xbf16>
    "tpu.trace_start"() <{level = 10 : i32, message = "bts,bsd->btd"}> : () -> ()
    %cst_17 = arith.constant dense<0.000000e+00> : vector<2x16x32xf32>
    %54 = tpu.matmul %52, %53, %cst_17 {dimension_numbers = #tpu.dot_dimension_numbers<[2], [1], [1], [2], [0, 0, 0, 1, 1, 2], [0], [0]>} : vector<2x16x16xbf16>, vector<2x16x32xbf16>, vector<2x16x32xf32> -> vector<2x16x32xf32>
    "tpu.trace_stop"() : () -> ()
    %cst_18 = arith.constant 1.000000e+00 : f32
    %55 = vector.broadcast %cst_18 : f32 to vector<2x16x1xf32>
    %56 = arith.divf %55, %51 : vector<2x16x1xf32>
    %57 = vector.broadcast %56 : vector<2x16x1xf32> to vector<2x16x32xf32>
    %58 = arith.mulf %54, %57 : vector<2x16x32xf32>
    %59 = vector.extract_strided_slice %12 {offsets = [0, 64], sizes = [32, 32], strides = [1, 1]} : vector<32x384xf32> to vector<32x32xf32>
    %60 = vector.shape_cast %59 : vector<32x32xf32> to vector<2x16x32xf32>
    %61 = vector.extract_strided_slice %12 {offsets = [0, 192], sizes = [32, 32], strides = [1, 1]} : vector<32x384xf32> to vector<32x32xf32>
    %62 = vector.shape_cast %61 : vector<32x32xf32> to vector<2x16x32xf32>
    %63 = vector.extract_strided_slice %12 {offsets = [0, 320], sizes = [32, 32], strides = [1, 1]} : vector<32x384xf32> to vector<32x32xf32>
    %64 = vector.shape_cast %63 : vector<32x32xf32> to vector<2x16x32xf32>
    %65 = arith.truncf %60 : vector<2x16x32xf32> to vector<2x16x32xbf16>
    %66 = arith.truncf %62 : vector<2x16x32xf32> to vector<2x16x32xbf16>
    "tpu.trace_start"() <{level = 10 : i32, message = "btd,bsd->bts"}> : () -> ()
    %cst_19 = arith.constant dense<0.000000e+00> : vector<2x16x16xf32>
    %67 = tpu.matmul %65, %66, %cst_19 {dimension_numbers = #tpu.dot_dimension_numbers<[2], [2], [1], [1], [0, 0, 0, 1, 1, 1], [0], [0]>} : vector<2x16x32xbf16>, vector<2x16x32xbf16>, vector<2x16x16xf32> -> vector<2x16x16xf32>
    "tpu.trace_stop"() : () -> ()
    %cst_20 = arith.constant dense<0xFF800000> : vector<2x16xf32>
    %68 = vector.multi_reduction <maximumf>, %67, %cst_20 [2] : vector<2x16x16xf32> to vector<2x16xf32>
    %69 = vector.shape_cast %68 : vector<2x16xf32> to vector<2x16x1xf32>
    %70 = vector.broadcast %69 : vector<2x16x1xf32> to vector<2x16x16xf32>
    %71 = arith.subf %67, %70 : vector<2x16x16xf32>
    %72 = math.exp %71 : vector<2x16x16xf32>
    %cst_21 = arith.constant dense<0.000000e+00> : vector<2x16xf32>
    %73 = vector.multi_reduction <add>, %72, %cst_21 [2] : vector<2x16x16xf32> to vector<2x16xf32>
    %74 = vector.shape_cast %73 : vector<2x16xf32> to vector<2x16x1xf32>
    %75 = arith.truncf %72 : vector<2x16x16xf32> to vector<2x16x16xbf16>
    %76 = arith.truncf %64 : vector<2x16x32xf32> to vector<2x16x32xbf16>
    "tpu.trace_start"() <{level = 10 : i32, message = "bts,bsd->btd"}> : () -> ()
    %cst_22 = arith.constant dense<0.000000e+00> : vector<2x16x32xf32>
    %77 = tpu.matmul %75, %76, %cst_22 {dimension_numbers = #tpu.dot_dimension_numbers<[2], [1], [1], [2], [0, 0, 0, 1, 1, 2], [0], [0]>} : vector<2x16x16xbf16>, vector<2x16x32xbf16>, vector<2x16x32xf32> -> vector<2x16x32xf32>
    "tpu.trace_stop"() : () -> ()
    %cst_23 = arith.constant 1.000000e+00 : f32
    %78 = vector.broadcast %cst_23 : f32 to vector<2x16x1xf32>
    %79 = arith.divf %78, %74 : vector<2x16x1xf32>
    %80 = vector.broadcast %79 : vector<2x16x1xf32> to vector<2x16x32xf32>
    %81 = arith.mulf %77, %80 : vector<2x16x32xf32>
    %82 = vector.extract_strided_slice %12 {offsets = [0, 96], sizes = [32, 32], strides = [1, 1]} : vector<32x384xf32> to vector<32x32xf32>
    %83 = vector.shape_cast %82 : vector<32x32xf32> to vector<2x16x32xf32>
    %84 = vector.extract_strided_slice %12 {offsets = [0, 224], sizes = [32, 32], strides = [1, 1]} : vector<32x384xf32> to vector<32x32xf32>
    %85 = vector.shape_cast %84 : vector<32x32xf32> to vector<2x16x32xf32>
    %86 = vector.extract_strided_slice %12 {offsets = [0, 352], sizes = [32, 32], strides = [1, 1]} : vector<32x384xf32> to vector<32x32xf32>
    %87 = vector.shape_cast %86 : vector<32x32xf32> to vector<2x16x32xf32>
    %88 = arith.truncf %83 : vector<2x16x32xf32> to vector<2x16x32xbf16>
    %89 = arith.truncf %85 : vector<2x16x32xf32> to vector<2x16x32xbf16>
    "tpu.trace_start"() <{level = 10 : i32, message = "btd,bsd->bts"}> : () -> ()
    %cst_24 = arith.constant dense<0.000000e+00> : vector<2x16x16xf32>
    %90 = tpu.matmul %88, %89, %cst_24 {dimension_numbers = #tpu.dot_dimension_numbers<[2], [2], [1], [1], [0, 0, 0, 1, 1, 1], [0], [0]>} : vector<2x16x32xbf16>, vector<2x16x32xbf16>, vector<2x16x16xf32> -> vector<2x16x16xf32>
    "tpu.trace_stop"() : () -> ()
    %cst_25 = arith.constant dense<0xFF800000> : vector<2x16xf32>
    %91 = vector.multi_reduction <maximumf>, %90, %cst_25 [2] : vector<2x16x16xf32> to vector<2x16xf32>
    %92 = vector.shape_cast %91 : vector<2x16xf32> to vector<2x16x1xf32>
    %93 = vector.broadcast %92 : vector<2x16x1xf32> to vector<2x16x16xf32>
    %94 = arith.subf %90, %93 : vector<2x16x16xf32>
    %95 = math.exp %94 : vector<2x16x16xf32>
    %cst_26 = arith.constant dense<0.000000e+00> : vector<2x16xf32>
    %96 = vector.multi_reduction <add>, %95, %cst_26 [2] : vector<2x16x16xf32> to vector<2x16xf32>
    %97 = vector.shape_cast %96 : vector<2x16xf32> to vector<2x16x1xf32>
    %98 = arith.truncf %95 : vector<2x16x16xf32> to vector<2x16x16xbf16>
    %99 = arith.truncf %87 : vector<2x16x32xf32> to vector<2x16x32xbf16>
    "tpu.trace_start"() <{level = 10 : i32, message = "bts,bsd->btd"}> : () -> ()
    %cst_27 = arith.constant dense<0.000000e+00> : vector<2x16x32xf32>
    %100 = tpu.matmul %98, %99, %cst_27 {dimension_numbers = #tpu.dot_dimension_numbers<[2], [1], [1], [2], [0, 0, 0, 1, 1, 2], [0], [0]>} : vector<2x16x16xbf16>, vector<2x16x32xbf16>, vector<2x16x32xf32> -> vector<2x16x32xf32>
    "tpu.trace_stop"() : () -> ()
    %cst_28 = arith.constant 1.000000e+00 : f32
    %101 = vector.broadcast %cst_28 : f32 to vector<2x16x1xf32>
    %102 = arith.divf %101, %97 : vector<2x16x1xf32>
    %103 = vector.broadcast %102 : vector<2x16x1xf32> to vector<2x16x32xf32>
    %104 = arith.mulf %100, %103 : vector<2x16x32xf32>
    %105 = tpu.concatenate %35, %58, %81, %104 in 2 : vector<2x16x32xf32>, vector<2x16x32xf32>, vector<2x16x32xf32>, vector<2x16x32xf32> -> vector<2x16x128xf32>
    %106 = vector.shape_cast %105 : vector<2x16x128xf32> to vector<32x128xf32>
    %107 = arith.truncf %106 : vector<32x128xf32> to vector<32x128xbf16>
    %c0_29 = arith.constant 0 : index
    %c0_30 = arith.constant 0 : index
    %c0_31 = arith.constant 0 : index
    %108 = vector.load %arg5[%c0_29, %c0_30, %c0_31] : memref<1x128x128xbf16, #tpu.memory_space<vmem>>, vector<1x128x128xbf16>
    %109 = vector.shape_cast %108 : vector<1x128x128xbf16> to vector<128x128xbf16>
    %cst_32 = arith.constant dense<0.000000e+00> : vector<32x128xf32>
    %110 = tpu.matmul %107, %109, %cst_32 {dimension_numbers = #tpu.dot_dimension_numbers<[1], [0], [0], [1], [0, 0, 1, 1], [], []>} : vector<32x128xbf16>, vector<128x128xbf16>, vector<32x128xf32> -> vector<32x128xf32>
    %c0_33 = arith.constant 0 : index
    %c0_34 = arith.constant 0 : index
    %c0_35 = arith.constant 0 : index
    %111 = vector.load %arg6[%c0_33, %c0_34, %c0_35] : memref<1x1x128xf32, #tpu.memory_space<vmem>>, vector<1x1x128xf32>
    %112 = vector.shape_cast %111 : vector<1x1x128xf32> to vector<1x128xf32>
    %113 = vector.broadcast %112 : vector<1x128xf32> to vector<32x128xf32>
    %114 = arith.addf %110, %113 : vector<32x128xf32>
    %115 = vector.shape_cast %114 : vector<32x128xf32> to vector<2x16x128xf32>
    %116 = arith.addf %3, %115 : vector<2x16x128xf32>
    %c0_36 = arith.constant 0 : index
    %c0_37 = arith.constant 0 : index
    %c0_38 = arith.constant 0 : index
    %117 = vector.load %arg11[%c0_36, %c0_37, %c0_38] : memref<1x1x128xf32, #tpu.memory_space<vmem>>, vector<1x1x128xf32>
    %118 = vector.shape_cast %117 : vector<1x1x128xf32> to vector<1x128xf32>
    %c0_39 = arith.constant 0 : index
    %c0_40 = arith.constant 0 : index
    %c0_41 = arith.constant 0 : index
    %119 = vector.load %arg12[%c0_39, %c0_40, %c0_41] : memref<1x1x128xf32, #tpu.memory_space<vmem>>, vector<1x1x128xf32>
    %120 = vector.shape_cast %119 : vector<1x1x128xf32> to vector<1x128xf32>
    %cst_42 = arith.constant dense<0.000000e+00> : vector<2x16xf32>
    %121 = vector.multi_reduction <add>, %116, %cst_42 [2] : vector<2x16x128xf32> to vector<2x16xf32>
    %122 = vector.shape_cast %121 : vector<2x16xf32> to vector<2x16x1xf32>
    %cst_43 = arith.constant 1.280000e+02 : f32
    %123 = vector.broadcast %cst_43 : f32 to vector<2x16x1xf32>
    %124 = arith.divf %122, %123 : vector<2x16x1xf32>
    %125 = vector.broadcast %124 : vector<2x16x1xf32> to vector<2x16x128xf32>
    %126 = arith.subf %116, %125 : vector<2x16x128xf32>
    %127 = arith.mulf %126, %126 : vector<2x16x128xf32>
    %cst_44 = arith.constant dense<0.000000e+00> : vector<2x16xf32>
    %128 = vector.multi_reduction <add>, %127, %cst_44 [2] : vector<2x16x128xf32> to vector<2x16xf32>
    %129 = vector.shape_cast %128 : vector<2x16xf32> to vector<2x16x1xf32>
    %cst_45 = arith.constant 1.280000e+02 : f32
    %130 = vector.broadcast %cst_45 : f32 to vector<2x16x1xf32>
    %131 = arith.divf %129, %130 : vector<2x16x1xf32>
    %132 = vector.broadcast %124 : vector<2x16x1xf32> to vector<2x16x128xf32>
    %133 = arith.subf %116, %132 : vector<2x16x128xf32>
    %cst_46 = arith.constant 9.99999974E-6 : f32
    %134 = vector.broadcast %cst_46 : f32 to vector<2x16x1xf32>
    %135 = arith.addf %131, %134 : vector<2x16x1xf32>
    %136 = math.rsqrt %135 : vector<2x16x1xf32>
    %137 = vector.broadcast %136 : vector<2x16x1xf32> to vector<2x16x128xf32>
    %138 = arith.mulf %133, %137 : vector<2x16x128xf32>
    %139 = vector.shape_cast %118 : vector<1x128xf32> to vector<1x1x128xf32>
    %140 = vector.broadcast %139 : vector<1x1x128xf32> to vector<2x16x128xf32>
    %141 = arith.mulf %138, %140 : vector<2x16x128xf32>
    %142 = vector.shape_cast %120 : vector<1x128xf32> to vector<1x1x128xf32>
    %143 = vector.broadcast %142 : vector<1x1x128xf32> to vector<2x16x128xf32>
    %144 = arith.addf %141, %143 : vector<2x16x128xf32>
    %145 = vector.shape_cast %144 : vector<2x16x128xf32> to vector<32x128xf32>
    %146 = arith.truncf %145 : vector<32x128xf32> to vector<32x128xbf16>
    %c0_47 = arith.constant 0 : index
    %c0_48 = arith.constant 0 : index
    %c0_49 = arith.constant 0 : index
    %147 = vector.load %arg7[%c0_47, %c0_48, %c0_49] : memref<1x128x256xbf16, #tpu.memory_space<vmem>>, vector<1x128x256xbf16>
    %148 = vector.shape_cast %147 : vector<1x128x256xbf16> to vector<128x256xbf16>
    %cst_50 = arith.constant dense<0.000000e+00> : vector<32x256xf32>
    %149 = tpu.matmul %146, %148, %cst_50 {dimension_numbers = #tpu.dot_dimension_numbers<[1], [0], [0], [1], [0, 0, 1, 1], [], []>} : vector<32x128xbf16>, vector<128x256xbf16>, vector<32x256xf32> -> vector<32x256xf32>
    %c0_51 = arith.constant 0 : index
    %c0_52 = arith.constant 0 : index
    %c0_53 = arith.constant 0 : index
    %150 = vector.load %arg8[%c0_51, %c0_52, %c0_53] : memref<1x1x256xf32, #tpu.memory_space<vmem>>, vector<1x1x256xf32>
    %151 = vector.shape_cast %150 : vector<1x1x256xf32> to vector<1x256xf32>
    %152 = vector.broadcast %151 : vector<1x256xf32> to vector<32x256xf32>
    %153 = arith.addf %149, %152 : vector<32x256xf32>
    %cst_54 = arith.constant 0.000000e+00 : f32
    %154 = vector.broadcast %cst_54 : f32 to vector<32x256xf32>
    %155 = arith.maximumf %153, %154 : vector<32x256xf32>
    %156 = arith.truncf %155 : vector<32x256xf32> to vector<32x256xbf16>
    %c0_55 = arith.constant 0 : index
    %c0_56 = arith.constant 0 : index
    %c0_57 = arith.constant 0 : index
    %157 = vector.load %arg9[%c0_55, %c0_56, %c0_57] : memref<1x256x128xbf16, #tpu.memory_space<vmem>>, vector<1x256x128xbf16>
    %158 = vector.shape_cast %157 : vector<1x256x128xbf16> to vector<256x128xbf16>
    %cst_58 = arith.constant dense<0.000000e+00> : vector<32x128xf32>
    %159 = tpu.matmul %156, %158, %cst_58 {dimension_numbers = #tpu.dot_dimension_numbers<[1], [0], [0], [1], [0, 0, 1, 1], [], []>} : vector<32x256xbf16>, vector<256x128xbf16>, vector<32x128xf32> -> vector<32x128xf32>
    %c0_59 = arith.constant 0 : index
    %c0_60 = arith.constant 0 : index
    %c0_61 = arith.constant 0 : index
    %160 = vector.load %arg10[%c0_59, %c0_60, %c0_61] : memref<1x1x128xf32, #tpu.memory_space<vmem>>, vector<1x1x128xf32>
    %161 = vector.shape_cast %160 : vector<1x1x128xf32> to vector<1x128xf32>
    %162 = vector.broadcast %161 : vector<1x128xf32> to vector<32x128xf32>
    %163 = arith.addf %159, %162 : vector<32x128xf32>
    %164 = vector.shape_cast %163 : vector<32x128xf32> to vector<2x16x128xf32>
    %165 = arith.addf %144, %164 : vector<2x16x128xf32>
    %c0_62 = arith.constant 0 : index
    %c0_63 = arith.constant 0 : index
    %c0_64 = arith.constant 0 : index
    %166 = vector.load %arg13[%c0_62, %c0_63, %c0_64] : memref<1x1x128xf32, #tpu.memory_space<vmem>>, vector<1x1x128xf32>
    %167 = vector.shape_cast %166 : vector<1x1x128xf32> to vector<1x128xf32>
    %c0_65 = arith.constant 0 : index
    %c0_66 = arith.constant 0 : index
    %c0_67 = arith.constant 0 : index
    %168 = vector.load %arg14[%c0_65, %c0_66, %c0_67] : memref<1x1x128xf32, #tpu.memory_space<vmem>>, vector<1x1x128xf32>
    %169 = vector.shape_cast %168 : vector<1x1x128xf32> to vector<1x128xf32>
    %cst_68 = arith.constant dense<0.000000e+00> : vector<2x16xf32>
    %170 = vector.multi_reduction <add>, %165, %cst_68 [2] : vector<2x16x128xf32> to vector<2x16xf32>
    %171 = vector.shape_cast %170 : vector<2x16xf32> to vector<2x16x1xf32>
    %cst_69 = arith.constant 1.280000e+02 : f32
    %172 = vector.broadcast %cst_69 : f32 to vector<2x16x1xf32>
    %173 = arith.divf %171, %172 : vector<2x16x1xf32>
    %174 = vector.broadcast %173 : vector<2x16x1xf32> to vector<2x16x128xf32>
    %175 = arith.subf %165, %174 : vector<2x16x128xf32>
    %176 = arith.mulf %175, %175 : vector<2x16x128xf32>
    %cst_70 = arith.constant dense<0.000000e+00> : vector<2x16xf32>
    %177 = vector.multi_reduction <add>, %176, %cst_70 [2] : vector<2x16x128xf32> to vector<2x16xf32>
    %178 = vector.shape_cast %177 : vector<2x16xf32> to vector<2x16x1xf32>
    %cst_71 = arith.constant 1.280000e+02 : f32
    %179 = vector.broadcast %cst_71 : f32 to vector<2x16x1xf32>
    %180 = arith.divf %178, %179 : vector<2x16x1xf32>
    %181 = vector.broadcast %173 : vector<2x16x1xf32> to vector<2x16x128xf32>
    %182 = arith.subf %165, %181 : vector<2x16x128xf32>
    %cst_72 = arith.constant 9.99999974E-6 : f32
    %183 = vector.broadcast %cst_72 : f32 to vector<2x16x1xf32>
    %184 = arith.addf %180, %183 : vector<2x16x1xf32>
    %185 = math.rsqrt %184 : vector<2x16x1xf32>
    %186 = vector.broadcast %185 : vector<2x16x1xf32> to vector<2x16x128xf32>
    %187 = arith.mulf %182, %186 : vector<2x16x128xf32>
    %188 = vector.shape_cast %167 : vector<1x128xf32> to vector<1x1x128xf32>
    %189 = vector.broadcast %188 : vector<1x1x128xf32> to vector<2x16x128xf32>
    %190 = arith.mulf %187, %189 : vector<2x16x128xf32>
    %191 = vector.shape_cast %169 : vector<1x128xf32> to vector<1x1x128xf32>
    %192 = vector.broadcast %191 : vector<1x1x128xf32> to vector<2x16x128xf32>
    %193 = arith.addf %190, %192 : vector<2x16x128xf32>
    %c0_73 = arith.constant 0 : index
    %c0_74 = arith.constant 0 : index
    %c0_75 = arith.constant 0 : index
    %194 = vector.load %arg18[%c0_73, %c0_74, %c0_75] : memref<2x16x128xf32, #tpu.memory_space<vmem>>, vector<2x16x128xf32>
    tpu.vector_store %arg18[%c0_73, %c0_74, %c0_75], %193 {strides = array<i32>} : memref<2x16x128xf32, #tpu.memory_space<vmem>>, vector<2x16x128xf32>,
    %c1_i32 = arith.constant 1 : i32
    %195 = arith.cmpi eq, %arg1, %c1_i32 : i32
    %196 = arith.extui %195 : i1 to i32
    %c0_i32_76 = arith.constant 0 : i32
    %197 = arith.cmpi ne, %196, %c0_i32_76 : i32
    scf.if %197 {
      %c0_77 = arith.constant 0 : index
      %c0_78 = arith.constant 0 : index
      %c0_79 = arith.constant 0 : index
      %198 = vector.load %arg18[%c0_77, %c0_78, %c0_79] : memref<2x16x128xf32, #tpu.memory_space<vmem>>, vector<2x16x128xf32>
      %c0_80 = arith.constant 0 : index
      %c0_81 = arith.constant 0 : index
      %199 = vector.load %arg15[%c0_80, %c0_81] : memref<1x128xf32, #tpu.memory_space<vmem>>, vector<1x128xf32>
      %c0_82 = arith.constant 0 : index
      %c0_83 = arith.constant 0 : index
      %200 = vector.load %arg16[%c0_82, %c0_83] : memref<1x128xf32, #tpu.memory_space<vmem>>, vector<1x128xf32>
      %cst_84 = arith.constant dense<0.000000e+00> : vector<2x16xf32>
      %201 = vector.multi_reduction <add>, %198, %cst_84 [2] : vector<2x16x128xf32> to vector<2x16xf32>
      %202 = vector.shape_cast %201 : vector<2x16xf32> to vector<2x16x1xf32>
      %cst_85 = arith.constant 1.280000e+02 : f32
      %203 = vector.broadcast %cst_85 : f32 to vector<2x16x1xf32>
      %204 = arith.divf %202, %203 : vector<2x16x1xf32>
      %205 = vector.broadcast %204 : vector<2x16x1xf32> to vector<2x16x128xf32>
      %206 = arith.subf %198, %205 : vector<2x16x128xf32>
      %207 = arith.mulf %206, %206 : vector<2x16x128xf32>
      %cst_86 = arith.constant dense<0.000000e+00> : vector<2x16xf32>
      %208 = vector.multi_reduction <add>, %207, %cst_86 [2] : vector<2x16x128xf32> to vector<2x16xf32>
      %209 = vector.shape_cast %208 : vector<2x16xf32> to vector<2x16x1xf32>
      %cst_87 = arith.constant 1.280000e+02 : f32
      %210 = vector.broadcast %cst_87 : f32 to vector<2x16x1xf32>
      %211 = arith.divf %209, %210 : vector<2x16x1xf32>
      %212 = vector.broadcast %204 : vector<2x16x1xf32> to vector<2x16x128xf32>
      %213 = arith.subf %198, %212 : vector<2x16x128xf32>
      %cst_88 = arith.constant 9.99999974E-6 : f32
      %214 = vector.broadcast %cst_88 : f32 to vector<2x16x1xf32>
      %215 = arith.addf %211, %214 : vector<2x16x1xf32>
      %216 = math.rsqrt %215 : vector<2x16x1xf32>
      %217 = vector.broadcast %216 : vector<2x16x1xf32> to vector<2x16x128xf32>
      %218 = arith.mulf %213, %217 : vector<2x16x128xf32>
      %219 = vector.shape_cast %199 : vector<1x128xf32> to vector<1x1x128xf32>
      %220 = vector.broadcast %219 : vector<1x1x128xf32> to vector<2x16x128xf32>
      %221 = arith.mulf %218, %220 : vector<2x16x128xf32>
      %222 = vector.shape_cast %200 : vector<1x128xf32> to vector<1x1x128xf32>
      %223 = vector.broadcast %222 : vector<1x1x128xf32> to vector<2x16x128xf32>
      %224 = arith.addf %221, %223 : vector<2x16x128xf32>
      %c0_89 = arith.constant 0 : index
      %c0_90 = arith.constant 0 : index
      %c0_91 = arith.constant 0 : index
      %225 = vector.load %arg17[%c0_89, %c0_90, %c0_91] : memref<2x16x128xf32, #tpu.memory_space<vmem>>, vector<2x16x128xf32>
      tpu.vector_store %arg17[%c0_89, %c0_90, %c0_91], %224 {strides = array<i32>} : memref<2x16x128xf32, #tpu.memory_space<vmem>>, vector<2x16x128xf32>,
    } else {
    }
    return
  }
  func.func @transform_0(%arg0: i32, %arg1: i32) -> (i32, i32, i32) {
    %c0_i32 = arith.constant 0 : i32
    %c0_i32_0 = arith.constant 0 : i32
    %c0_i32_1 = arith.constant 0 : i32
    return %arg0, %c0_i32, %c0_i32_0 : i32, i32, i32
  }
  func.func @transform_1(%arg0: i32, %arg1: i32) -> (i32, i32, i32) {
    %c0_i32 = arith.constant 0 : i32
    %c0_i32_0 = arith.constant 0 : i32
    %c0_i32_1 = arith.constant 0 : i32
    return %arg1, %c0_i32, %c0_i32_0 : i32, i32, i32
  }
  func.func @transform_2(%arg0: i32, %arg1: i32) -> (i32, i32, i32) {
    %c0_i32 = arith.constant 0 : i32
    %c0_i32_0 = arith.constant 0 : i32
    %c0_i32_1 = arith.constant 0 : i32
    return %arg1, %c0_i32, %c0_i32_0 : i32, i32, i32
  }
  func.func @transform_3(%arg0: i32, %arg1: i32) -> (i32, i32, i32) {
    %c0_i32 = arith.constant 0 : i32
    %c0_i32_0 = arith.constant 0 : i32
    %c0_i32_1 = arith.constant 0 : i32
    return %arg1, %c0_i32, %c0_i32_0 : i32, i32, i32
  }
  func.func @transform_4(%arg0: i32, %arg1: i32) -> (i32, i32, i32) {
    %c0_i32 = arith.constant 0 : i32
    %c0_i32_0 = arith.constant 0 : i32
    %c0_i32_1 = arith.constant 0 : i32
    return %arg1, %c0_i32, %c0_i32_0 : i32, i32, i32
  }
  func.func @transform_5(%arg0: i32, %arg1: i32) -> (i32, i32, i32) {
    %c0_i32 = arith.constant 0 : i32
    %c0_i32_0 = arith.constant 0 : i32
    %c0_i32_1 = arith.constant 0 : i32
    return %arg1, %c0_i32, %c0_i32_0 : i32, i32, i32
  }
  func.func @transform_6(%arg0: i32, %arg1: i32) -> (i32, i32, i32) {
    %c0_i32 = arith.constant 0 : i32
    %c0_i32_0 = arith.constant 0 : i32
    %c0_i32_1 = arith.constant 0 : i32
    return %arg1, %c0_i32, %c0_i32_0 : i32, i32, i32
  }
  func.func @transform_7(%arg0: i32, %arg1: i32) -> (i32, i32, i32) {
    %c0_i32 = arith.constant 0 : i32
    %c0_i32_0 = arith.constant 0 : i32
    %c0_i32_1 = arith.constant 0 : i32
    return %arg1, %c0_i32, %c0_i32_0 : i32, i32, i32
  }
  func.func @transform_8(%arg0: i32, %arg1: i32) -> (i32, i32, i32) {
    %c0_i32 = arith.constant 0 : i32
    %c0_i32_0 = arith.constant 0 : i32
    %c0_i32_1 = arith.constant 0 : i32
    return %arg1, %c0_i32, %c0_i32_0 : i32, i32, i32
  }
  func.func @transform_9(%arg0: i32, %arg1: i32) -> (i32, i32, i32) {
    %c0_i32 = arith.constant 0 : i32
    %c0_i32_0 = arith.constant 0 : i32
    %c0_i32_1 = arith.constant 0 : i32
    return %arg1, %c0_i32, %c0_i32_0 : i32, i32, i32
  }
  func.func @transform_10(%arg0: i32, %arg1: i32) -> (i32, i32, i32) {
    %c0_i32 = arith.constant 0 : i32
    %c0_i32_0 = arith.constant 0 : i32
    %c0_i32_1 = arith.constant 0 : i32
    return %arg1, %c0_i32, %c0_i32_0 : i32, i32, i32
  }
  func.func @transform_11(%arg0: i32, %arg1: i32) -> (i32, i32, i32) {
    %c0_i32 = arith.constant 0 : i32
    %c0_i32_0 = arith.constant 0 : i32
    %c0_i32_1 = arith.constant 0 : i32
    return %arg1, %c0_i32, %c0_i32_0 : i32, i32, i32
  }
  func.func @transform_12(%arg0: i32, %arg1: i32) -> (i32, i32, i32) {
    %c0_i32 = arith.constant 0 : i32
    %c0_i32_0 = arith.constant 0 : i32
    %c0_i32_1 = arith.constant 0 : i32
    return %arg1, %c0_i32, %c0_i32_0 : i32, i32, i32
  }
  func.func @transform_13(%arg0: i32, %arg1: i32) -> (i32, i32) {
    %c0_i32 = arith.constant 0 : i32
    %c0_i32_0 = arith.constant 0 : i32
    %c0_i32_1 = arith.constant 0 : i32
    return %c0_i32, %c0_i32_0 : i32, i32
  }
  func.func @transform_14(%arg0: i32, %arg1: i32) -> (i32, i32) {
    %c0_i32 = arith.constant 0 : i32
    %c0_i32_0 = arith.constant 0 : i32
    %c0_i32_1 = arith.constant 0 : i32
    return %c0_i32, %c0_i32_0 : i32, i32
  }
  func.func @transform_15(%arg0: i32, %arg1: i32) -> (i32, i32, i32) {
    %c0_i32 = arith.constant 0 : i32
    %c0_i32_0 = arith.constant 0 : i32
    %c0_i32_1 = arith.constant 0 : i32
    return %arg0, %c0_i32, %c0_i32_0 : i32, i32, i32
  }
}

</mosaic_0001>

<bundles_post_ra>
// kernel: tpu_custom_call.1
= control target key start
LH: loop header
LB: loop body
LE: loop exit
PB: predicated region body
PF: predicated region fallthrough
CT: control target
= control target key end

     0   :  { %s4799_s0 = inlined_call_operand.hbm [shape: f32[2,16,128], index: 0, kind: input, shape index: {}]   ;;  %s4800_s1 = inlined_call_operand.hbm [shape: bf16[2,128,384], index: 1, kind: input, shape index: {}]   ;;  %s4801_s2 = inlined_call_operand.vmem [shape: f32[2,1,384], index: 2, kind: input, shape index: {}]   ;;  %s4802_s3 = inlined_call_operand.hbm [shape: bf16[2,128,128], index: 3, kind: input, shape index: {}]   ;;  %s4803_s4 = inlined_call_operand.vmem [shape: f32[2,1,128], index: 4, kind: input, shape index: {}]   ;;  %s4804_s5 = inlined_call_operand.hbm [shape: bf16[2,128,256], index: 5, kind: input, shape index: {}]   ;;  %s4805_s6 = inlined_call_operand.vmem [shape: f32[2,1,256], index: 6, kind: input, shape index: {}]   ;;  %s4806_s7 = inlined_call_operand.hbm [shape: bf16[2,256,128], index: 7, kind: input, shape index: {}]   ;;  %s4807_s8 = inlined_call_operand.vmem [shape: f32[2,1,128], index: 8, kind: input, shape index: {}]   ;;  %s4808_s9 = inlined_call_operand.vmem [shape: f32[2,1,128], index: 9, kind: input, shape index: {}]   ;;  %s4809_s10 = inlined_call_operand.vmem [shape: f32[2,1,128], index: 10, kind: input, shape index: {}]   ;;  %s4810_s11 = inlined_call_operand.vmem [shape: f32[2,1,128], index: 11, kind: input, shape index: {}]   ;;  %s4811_s12 = inlined_call_operand.vmem [shape: f32[2,1,128], index: 12, kind: input, shape index: {}]   ;;  %s4812_s13 = inlined_call_operand.vmem [shape: f32[1,128], index: 13, kind: input, shape index: {}]   ;;  %s4813_s14 = inlined_call_operand.vmem [shape: f32[1,128], index: 14, kind: input, shape index: {}]   ;;  %s4814_s15 = inlined_call_operand.hbm [shape: f32[2,16,128], index: 15, kind: output, shape index: {}]  }
   0x1   :  { %4833 = sst [smem:[#allocation24_spill]] %s4799_s0 }
   0x2   :  { %4834 = sst [smem:[#allocation25_spill]] %s4800_s1 }
   0x3   :  { %4835 = sst [smem:[#allocation26_spill]] %s4801_s2 }
   0x4   :  { %4836 = sst [smem:[#allocation27_spill]] %s4802_s3 }
   0x5   :  { %4837 = sst [smem:[#allocation28_spill]] %s4804_s5 }
   0x6   :  { %4838 = sst [smem:[#allocation29_spill]] %s4805_s6 }
   0x7   :  { %4839 = sst [smem:[#allocation30_spill]] %s4806_s7 }
   0x8   :  { %4840 = sst [smem:[#allocation31_spill]] %s4808_s9 }
   0x9   :  { %4841 = sst [smem:[#allocation32_spill]] %s4809_s10 }
   0xa   :  { %4842 = sst [smem:[#allocation33_spill]] %s4810_s11 }
   0xb   :  { %4843 = sst [smem:[#allocation34_spill]] %s4811_s12 }
   0xc   :  { %4844 = sst [smem:[#allocation35_spill]] %s4812_s13 }
   0xd   :  { %4845 = sst [smem:[#allocation36_spill]] %s4813_s14 }
   0xe   :  { %4846 = sst [smem:[#allocation37_spill]] %s4814_s15 }
   0xf   :  { %20 = vsyncpa [#allocation4], 0 }
  0x10   :  { %21 = vsyncpa [#allocation7], 0 }
  0x11   :  { %23 = vsyncpa [#allocation7 + $0x1], 0 }
  0x12   :  { %24 = vsyncpa [#allocation10], 0 }
  0x13   :  { %26 = vsyncpa [#allocation10 + $0x1], 0 }
  0x14   :  { %27 = vsyncpa [#allocation5], 0  ;;  %s4032_s18 = smov 0   ;;  %s4034_s19 = smov 0  }
  0x15   :  { %s4036_s20 = smov 0   ;;  %s4038_s21 = smov 0  }
  0x16   :  { %s4040_s22 = smov 0   ;;  %s4042_s23 = smov 0  }
  0x17 LB: > { %4847 = sst [smem:[#allocation17_spill]] %s3914_s19  ;;  %s42_s24 = sadd.s32 1, %s3926_s22  ;;  %s3930_s23 = sphi %s4042_s23, %s33_s23   ;;  %s3926_s22 = sphi %s4040_s22, %s4896_s22   ;;  %s3922_s21 = sphi %s4038_s21, %s4895_s21   ;;  %s3918_s20 = sphi %s4036_s20, %s4894_s20   ;;  %s3914_s19 = sphi %s4034_s19, %s4893_s19   ;;  %s3910_s18 = sphi %s4032_s18, %s4892_s18  }
  0x18   : > { %4848 = sst [smem:[#allocation18_spill]] %s3918_s20  ;;  %s78_s25 = sadd.s32 1, %s3918_s20 }
  0x19   : > { %4849 = sst [smem:[#allocation19_spill]] %s3926_s22  ;;  %p43_p0 = scmp.ge.s32.totalorder %s42_s24, 2 }
  0x1a   : > { %4850 = sst [smem:[#allocation20_spill]] %s3930_s23  ;;  %p85_p1 = scmp.ne.s32.totalorder %s3918_s20, %s3914_s19 }
  0x1b   : > { %p86_p2 = scmp.eq.s32.totalorder %s3930_s23, 0  ;;  %s4898_s24 = smov (%p43_p0, %s42_s24), 0 }
  0x1c   : > { %4851 = sst [smem:[#allocation21_spill]] %s4898_s24  ;;  %p3424_p4 = scmp.lt.s32.totalorder %s3930_s23, 2 }
  0x1d   : > { %p87_p3 = por %p86_p2, %p85_p1  ;;  %s75_s26 = ssub.s32 %s3926_s22, %s4898_s24 }
  0x1e   : > { %p76_p5 = scmp.eq.s32.totalorder %s75_s26, 0  ;;  %s4074_s28 = sand.u32 1, %s3918_s20  }
  0x1f   : > { %s3387_s29 = smul.u32 3072, %s3926_s22  ;;  %s4853_s1 = sld [smem:[#allocation25_spill]] }
  0x20   : > { %s4078_s30 = scalar_select %p76_p5, %s3918_s20, %s78_s25  }
  0x21   : > { %s3386_s16 = smul.u32 192, %s4074_s28  ;;  %p4086_p6 = pnand %p3424_p4, %p87_p3 }
  0x22   : > { %4852 = sst [smem:[#allocation22_spill]] %s4078_s30  ;;  %s4855_s25 = sand.u32 1, %s3930_s23  }
  0x23   : > { %s4854_s24 = scalar_select %p4086_p6, 1, 0 }
  0x24   : > { %s496_s26 = scalar_lea.vmem [#allocation6], %s3386_s16  ;;  %s4094_s30 = scalar_lea.sflag [#allocation7], %s4855_s25 }
  0x25   : > { %s4084_s14 = scalar_lea.hbm %s4853_s1, %s3387_s29  ;;  %s503_s27 = sshll.u32 %s496_s26, 4  ;;  %s4090_s27 = int_to_ptr.vmem [resolvable:$true] %s503_s27 }
  0x26   : > { %s3694_s20 = scalar_lea.hbm %s4084_s14, 3072  ;;  %p4100_p8 = pneg %p4086_p6 }
  0x27   : > { %p3695_p7 = scmp.ne.s32.totalorder %s4084_s14, %s3694_s20  ;;  %s3699_s16 = scalar_lea.hbm %s4853_s1, 6144 }
  0x28   : > { %s4856_s15 = scalar_select %p4100_p8, 1, 0 }
  0x29   : > { %p3697_p9 = pnand %p4100_p8, %p3695_p7  ;;  %p3700_p11 = scmp.lt.u32.totalorder %s4084_s14, %s4853_s1 }
  0x2a   : > { %p3701_p12 = scmp.lt.u32.totalorder %s3699_s16, %s3694_s20  ;;  %p3703_p0 = scmp.lt.u32.totalorder %s3694_s20, %s4084_s14 }
  0x2b   : > { %p3698_p10 = pneg %p3697_p9 }
  0x2c   : > { %p3702_p13 = por %p3701_p12, %p3700_p11 }
  0x2e   : > { %p3704_p1 = por %p3703_p0, %p3702_p13 }
  0x30   : > { %p3705_p2 = pnand %p3704_p1, %p3698_p10 }
  0x32   : > { %3708 = shalt.err (!%p3705_p2)
}
  0x33   : > { %s3709_s25 = scalar_lea.vmem %s4090_s27, 3072  ;;  %s3932_s29 = smov [#allocation6]  }
  0x34   : > { %p3710_p3 = scmp.ne.s32.totalorder %s4090_s27, %s3709_s25  ;;  %s3714_s17 = sshll.u32 %s3932_s29, 4  ;;  %s3715_s17 = int_to_ptr.vmem [resolvable:$false] %s3714_s17 }
  0x35   : > { %s3716_s13 = scalar_lea.vmem %s3715_s17, 6144  ;;  %p3717_p7 = scmp.lt.s32.totalorder %s4090_s27, %s3715_s17 }
  0x36   : > { %p3712_p4 = pnand %p3710_p3, %p4100_p8  ;;  %p3718_p9 = scmp.lt.s32.totalorder %s3716_s13, %s3709_s25 }
  0x38   : > { %p3713_p5 = pneg %p3712_p4  ;;  %p3719_p11 = por %p3718_p9, %p3717_p7 }
  0x3a   : > { %p3720_p12 = pnand %p3719_p11, %p3713_p5 }
  0x3c   : > { %3723 = shalt.err (!%p3720_p12)
}
  0x3d   : > { %s3933_s20 = smov 192   ;;  %s3934_s16 = smov 12  }
  0x3e   : > { %3413 = dma.hbm_to_vmem [thread:$0]  (!%p4086_p6), %s4084_s14, 3072, %s4090_s27, %s4094_s30, %s3933_s20, %s3933_s20, %s3934_s16  }
  0x3f   : > { %s4818_s26 = sshll.u32 %s4074_s28, 7  ;;  %s3168_s29 = sshll.u32 %s3926_s22, 11 }
  0x40   : > { %s4857_s5 = sld [smem:[#allocation28_spill]]  ;;  %s551_s1 = scalar_lea.vmem [#allocation9], %s4818_s26 }
  0x41   : > { %s558_s12 = sshll.u32 %s551_s1, 4  ;;  %s4858_s7 = sld [smem:[#allocation30_spill]]  ;;  %s4133_s12 = int_to_ptr.vmem [resolvable:$true] %s558_s12 }
  0x42   : > { %s4859_s27 = sand.u32 1, %s3930_s23  }
  0x43   : > { %s4142_s20 = scalar_lea.sflag [#allocation10], %s4859_s27 }
  0x46   : > { %s4129_s13 = scalar_lea.hbm %s4857_s5, %s3168_s29  ;;  %s3729_s26 = scalar_lea.hbm %s4857_s5, 4096 }
  0x47   : > { %s4138_s14 = scalar_lea.hbm %s4858_s7, %s3168_s29  ;;  %s3724_s16 = scalar_lea.hbm %s4129_s13, 2048 }
  0x48   : > { %p3725_p10 = scmp.ne.s32.totalorder %s4129_s13, %s3724_s16  ;;  %p3730_p1 = scmp.lt.u32.totalorder %s4129_s13, %s4857_s5 }
  0x49   : > { %p3731_p2 = scmp.lt.u32.totalorder %s3729_s26, %s3724_s16  ;;  %p3733_p4 = scmp.lt.u32.totalorder %s3724_s16, %s4129_s13 }
  0x4a   : > { %p3727_p13 = pnand %p3725_p10, %p4100_p8 }
  0x4b   : > { %p3732_p3 = por %p3731_p2, %p3730_p1 }
  0x4c   : > { %p3728_p0 = pneg %p3727_p13 }
  0x4d   : > { %p3734_p5 = por %p3733_p4, %p3732_p3 }
  0x4f   : > { %p3735_p7 = pnand %p3734_p5, %p3728_p0 }
  0x51   : > { %3738 = shalt.err (!%p3735_p7)
}
  0x52   : > { %s3739_s10 = scalar_lea.vmem %s4133_s12, 2048  ;;  %s3935_s11 = smov [#allocation9]  }
  0x53   : > { %p3740_p9 = scmp.ne.s32.totalorder %s4133_s12, %s3739_s10  ;;  %s3744_s29 = sshll.u32 %s3935_s11, 4  ;;  %s3745_s29 = int_to_ptr.vmem [resolvable:$false] %s3744_s29 }
  0x54   : > { %s3746_s9 = scalar_lea.vmem %s3745_s29, 4096  ;;  %p3747_p10 = scmp.lt.s32.totalorder %s4133_s12, %s3745_s29 }
  0x55   : > { %p3742_p11 = pnand %p3740_p9, %p4100_p8  ;;  %p3748_p13 = scmp.lt.s32.totalorder %s3746_s9, %s3739_s10 }
  0x57   : > { %p3743_p12 = pneg %p3742_p11  ;;  %p3749_p1 = por %p3748_p13, %p3747_p10 }
  0x59   : > { %p3750_p2 = pnand %p3749_p1, %p3743_p12 }
  0x5b   : > { %3753 = shalt.err (!%p3750_p2)
}
  0x5c   : > { %s4819_s26 = smov 128   ;;  %s4820_s27 = smov 8  }
  0x5d   : > { %3419 = dma.hbm_to_vmem [thread:$0]  (!%p4086_p6), %s4129_s13, 2048, %s4133_s12, %s4142_s20, %s4819_s26, %s4819_s26, %s4820_s27  }
  0x5e   : > { %s4860_s16 = sshll.u32 %s4074_s28, 7  ;;  %s4174_s1 = sadd.s32 4294967295, %s3930_s23  }
  0x5f   : > { %s579_s17 = scalar_lea.vmem [#allocation11], %s4860_s16  ;;  %4861 = sst [smem:[#allocation23_spill]] %s4174_s1 }
  0x60   : > { %s586_s25 = sshll.u32 %s579_s17, 4  ;;  %p91_p0 = scmp.ne.s32.totalorder %s3914_s19, %s3910_s18  ;;  %s4171_s25 = int_to_ptr.vmem [resolvable:$true] %s586_s25 }
  0x61   : > { %p4823_p3 = scmp.eq.s32.totalorder %s4174_s1, 0  ;;  %p3054_p4 = scmp.ge.s32.totalorder %s3930_s23, 1 }
  0x62   : > { %p456_p5 = scmp.lt.s32.totalorder %s3930_s23, 3  ;;  %s3938_s13 = smov [#allocation3]  }
  0x63   : > { %p4183_p7 = por %p4823_p3, %p91_p0  ;;  %s472_s11 = sshll.u32 %s3938_s13, 4  ;;  %s4191_s11 = int_to_ptr.vmem [resolvable:$true] %s472_s11 }
  0x64   : > { %p4187_p9 = pnand %p3054_p4, %p456_p5  ;;  %s3058_s29 = sshll.u32 %s4074_s28, 6 }
  0x65   : > { %s4862_s10 = scalar_select %p4183_p7, 1, 0 }
  0x66   : > { %s4863_s12 = scalar_select %p4187_p9, 1, 0 }
  0x67   : > { %p3406_p11 = pneg %p4187_p9  ;;  %s3167_s18 = sshll.u32 %s3926_s22, 10 }
  0x68   : > { %s524_s9 = scalar_lea.vmem [#allocation8], %s3058_s29  ;;  %s4865_s3 = sld [smem:[#allocation27_spill]] }
  0x69   : > { %s531_s16 = sshll.u32 %s524_s9, 4  ;;  %p4199_p12 = pnand %p3406_p11, %p4823_p3  ;;  %s4208_s16 = int_to_ptr.vmem [resolvable:$true] %s531_s16 }
  0x6a   : > { %s4866_s0 = sld [smem:[#allocation24_spill]] }
  0x6b   : > { %p3756_p13 = pneg %p4199_p12 }
  0x6e   : > { %s4206_s5 = scalar_lea.hbm %s4865_s3, %s3167_s18 }
  0x70   : > { %s3754_s23 = scalar_lea.hbm %s4866_s0, 512 }
  0x71   : > { %p3755_p10 = scmp.ne.s32.totalorder %s4866_s0, %s3754_s23  ;;  %p3761_p0 = scmp.lt.u32.totalorder %s3754_s23, %s4866_s0 }
  0x73   : > { %p3757_p1 = pnand %p3756_p13, %p3755_p10 }
  0x75   : > { %p3758_p2 = pneg %p3757_p1 }
  0x77   : > { %p3763_p4 = pnand %p3761_p0, %p3758_p2 }
  0x79   : > { %3766 = shalt.err (!%p3763_p4)
}
  0x7a   : > { %s3767_s26 = scalar_lea.vmem %s4191_s11, 512  ;;  %p3775_p7 = scmp.lt.s32.totalorder %s4191_s11, %s4191_s11 }
  0x7b   : > { %p3768_p5 = scmp.ne.s32.totalorder %s4191_s11, %s3767_s26  ;;  %p3776_p9 = scmp.lt.s32.totalorder %s3767_s26, %s3767_s26 }
  0x7d   : > { %p3770_p11 = pnand %p3768_p5, %p3756_p13  ;;  %p3777_p6 = por %p3776_p9, %p3775_p7 }
  0x7f   : > { %p3771_p3 = pneg %p3770_p11 }
  0x81   : > { %p3778_p8 = pnand %p3777_p6, %p3771_p3 }
  0x83   : > { %3781 = shalt.err (!%p3778_p8)
}
  0x84   : > { %s4867_s22 = smov 8   ;;  %s4868_s6 = smov 128  }
  0x85   : > { %3409 = dma.hbm_to_vmem [thread:$0]  (!%p4199_p12), %s4866_s0, 512, %s4191_s11, [#allocation4], %s4868_s6, %s4868_s6, %s4867_s22  }
  0x86   : > { %s3782_s18 = scalar_lea.hbm %s4206_s5, 1024  ;;  %p4869_p7 = scmp.ne.s32.totalorder %s4856_s15, 0 }
  0x87   : > { %p3783_p10 = scmp.ne.s32.totalorder %s4206_s5, %s3782_s18  ;;  %s3787_s28 = scalar_lea.hbm %s4865_s3, 2048 }
  0x88   : > { %p3788_p3 = scmp.lt.u32.totalorder %s4206_s5, %s4865_s3  ;;  %p3789_p9 = scmp.lt.u32.totalorder %s3787_s28, %s3782_s18 }
  0x89   : > { %p3785_p6 = pnand %p3783_p10, %p4869_p7  ;;  %p3791_p1 = scmp.lt.u32.totalorder %s3782_s18, %s4206_s5 }
  0x8a   : > { %p3790_p13 = por %p3789_p9, %p3788_p3 }
  0x8b   : > { %p3786_p8 = pneg %p3785_p6 }
  0x8c   : > { %p3792_p2 = por %p3791_p1, %p3790_p13 }
  0x8e   : > { %p3793_p0 = pnand %p3792_p2, %p3786_p8 }
  0x90   : > { %3796 = shalt.err (!%p3793_p0)
}
  0x91   : > { %s3797_s11 = scalar_lea.vmem %s4208_s16, 1024  ;;  %s3939_s26 = smov [#allocation8]  }
  0x92   : > { %p3798_p12 = scmp.ne.s32.totalorder %s4208_s16, %s3797_s11  ;;  %s3802_s22 = sshll.u32 %s3939_s26, 4  ;;  %s3803_s22 = int_to_ptr.vmem [resolvable:$false] %s3802_s22 }
  0x93   : > { %s3804_s6 = scalar_lea.vmem %s3803_s22, 2048  ;;  %p3805_p11 = scmp.lt.s32.totalorder %s4208_s16, %s3803_s22 }
  0x94   : > { %p3800_p4 = pnand %p3798_p12, %p4869_p7  ;;  %p3806_p10 = scmp.lt.s32.totalorder %s3804_s6, %s3797_s11 }
  0x96   : > { %p3801_p5 = pneg %p3800_p4  ;;  %p3807_p6 = por %p3806_p10, %p3805_p11 }
  0x98   : > { %p3808_p3 = pnand %p3807_p6, %p3801_p5 }
  0x9a   : > { %3811 = shalt.err (!%p3808_p3)
}
  0x9b   : > { %s3940_s23 = smov 64   ;;  %s3941_s27 = smov 4  }
  0x9c   : > { %p4870_p8 = scmp.ne.s32.totalorder %s4854_s24, 0  ;;  %s3812_s18 = scalar_lea.hbm %s4138_s14, 2048 }
  0x9d   : > { %p3813_p9 = scmp.ne.s32.totalorder %s4138_s14, %s3812_s18  ;;  %s3817_s28 = scalar_lea.hbm %s4858_s7, 4096 }
  0x9e   : > { %3416 = dma.hbm_to_vmem [thread:$0]  (!%p4870_p8), %s4206_s5, 1024, %s4208_s16, %s4094_s30, %s3940_s23, %s3940_s23, %s3941_s27  }
  0x9f   : > { %p3815_p13 = pnand %p3813_p9, %p4869_p7  ;;  %p3818_p2 = scmp.lt.u32.totalorder %s4138_s14, %s4858_s7 }
  0xa0   : > { %p3819_p0 = scmp.lt.u32.totalorder %s3817_s28, %s3812_s18  ;;  %p3821_p4 = scmp.lt.u32.totalorder %s3812_s18, %s4138_s14 }
  0xa1   : > { %p3816_p1 = pneg %p3815_p13 }
  0xa2   : > { %p3820_p12 = por %p3819_p0, %p3818_p2 }
  0xa4   : > { %p3822_p5 = por %p3821_p4, %p3820_p12 }
  0xa6   : > { %p3823_p11 = pnand %p3822_p5, %p3816_p1 }
  0xa8   : > { %3826 = shalt.err (!%p3823_p11)
}
  0xa9   : > { %s3827_s5 = scalar_lea.vmem %s4171_s25, 2048  ;;  %s3942_s30 = smov [#allocation11]  }
  0xaa   : > { %p3828_p10 = scmp.ne.s32.totalorder %s4171_s25, %s3827_s5  ;;  %s3832_s16 = sshll.u32 %s3942_s30, 4  ;;  %s3833_s16 = int_to_ptr.vmem [resolvable:$false] %s3832_s16 }
  0xab   : > { %s3834_s11 = scalar_lea.vmem %s3833_s16, 4096  ;;  %p3835_p9 = scmp.lt.s32.totalorder %s4171_s25, %s3833_s16 }
  0xac   : > { %p3830_p6 = pnand %p3828_p10, %p4869_p7  ;;  %p3836_p13 = scmp.lt.s32.totalorder %s3834_s11, %s3827_s5 }
  0xae   : > { %p3831_p3 = pneg %p3830_p6  ;;  %p3837_p2 = por %p3836_p13, %p3835_p9 }
  0xb0   : > { %p3838_p0 = pnand %p3837_p2, %p3831_p3 }
  0xb2   : > { %3841 = shalt.err (!%p3838_p0)
}
  0xb3   : > { %3422 = dma.hbm_to_vmem [thread:$0]  (!%p4870_p8), %s4138_s14, 2048, %s4171_s25, %s4142_s20, %s3940_s23, %s3940_s23, %s3941_s27  }
  0xb4   : > { %p4871_p7 = scmp.ne.s32.totalorder %s4863_s12, 0 }
  0xb5   : > { %p4872_p1 = scmp.eq.s32.totalorder (!%p4871_p7), %s4174_s1, 0 }
  0xb6   : > { %628 = sbr.rel (%p4871_p7) target bundleno = 3999 (0xf9f), region = 80 }
  0xbd   : > { %3893 = dma.done.wait (%p4872_p1), [#allocation4], 512   ;;  %p4873_p12 = pmov %p4872_p1 }
  0xbe   : > { %s634_s24 = sand.u32 1, %s4174_s1   ;;  %s636_s15 = sand.u32 1, %s3914_s19  }
  0xbf   : > { %3895 = vsyncadd (%p4873_p12), [#allocation4], 4294966784  ;;  %s3388_s26 = smul.u32 192, %s636_s15  ;;  %s635_s22 = scalar_lea.sflag [#allocation7], %s634_s24 }
  0xc0   : > { %p4874_p4 = scmp.ne.s32.totalorder %s4862_s10, 0 }
  0xc1   : > { %s4292_s6 = scalar_lea.vmem [#allocation6], %s3388_s26 }
  0xc2   : > { %3897 = dma.done.wait (%p4874_p4), %s635_s22, 4096  }
  0xc3   : > { %3899 = vsyncadd (%p4874_p4), %s635_s22, 4294963200  ;;  %s3069_s14 = sshll.u32 %s636_s15, 6  ;;  %s3070_s20 = sshll.u32 %s636_s15, 7 }
  0xc4   : > { %s4298_s25 = scalar_lea.vmem [#allocation8], %s3069_s14  ;;  %s653_s12 = scalar_lea.sflag [#allocation10], %s634_s24 }
  0xc5   : > { %s4300_s23 = scalar_lea.vmem [#allocation9], %s3070_s20 }
  0xc6   : > { %3901 = dma.done.wait (%p4874_p4), %s653_s12, 4096  }
  0xc7   : > { %3903 = vsyncadd (%p4874_p4), %s653_s12, 4294963200  ;;  %p749_p8 = scmp.lt.s32.totalorder %s3922_s21, 1  ;;  %s4875_s2 = sld [smem:[#allocation26_spill]] }
  0xc8   : > { %s4876_s26 = sld [smem:[#allocation29_spill]]  ;;  %s4877_s0 = sld [smem:[#allocation31_spill]] }
  0xc9   : > { %s4308_s27 = scalar_select %p749_p8, %s3922_s21, 1 }
  0xca   : > { %s4878_s3 = sld [smem:[#allocation32_spill]]  ;;  %s4879_s5 = sld [smem:[#allocation33_spill]] }
  0xcb   : > { %s3389_s18 = smul.u32 3, %s4308_s27  ;;  %s3072_s10 = sshll.u32 %s4308_s27, 1 }
  0xcc   : > { %s4880_s16 = sld [smem:[#allocation34_spill]]  ;;  %s4346_s1 = scalar_lea.vmem [#allocation11], %s3070_s20 }
  0xcd   : > { %s4323_s11 = scalar_lea.vmem %s4875_s2, %s3389_s18  ;;  %p3073_p5 = scmp.ne.s32.totalorder %s3922_s21, 0 }
  0xce   : > { %s4328_s22 = scalar_lea.vmem %s4876_s26, %s3072_s10  ;;  %s765_s13 = scalar_lea.vmem %s4877_s0, %s4308_s27  ;;  %v781_v0 = vld [vmem:[#allocation3] sm:$0xff] (!%p3073_p5)  ;;  %v782_v1 = vld [vmem:[#allocation3 + $0x8] sm:$0xff] (!%p3073_p5)  ;;  %v783_v2 = vld [vmem:[#allocation3 + $0x10] sm:$0xff] (!%p3073_p5) }
  0xcf   : > { %780 = sbr.rel (%p3073_p5) target bundleno = 214 (0xd6), region = 104  ;;  %785 = vst [vmem:[#allocation2] sm:$0xff] (!%p3073_p5), %v781_v0  ;;  %786 = vst [vmem:[#allocation2 + $0x8] sm:$0xff] (!%p3073_p5), %v782_v1  ;;  %v784_v3 = vld [vmem:[#allocation3 + $0x18] sm:$0xff] (!%p3073_p5) }
  0xd0   : > { %s768_s7 = scalar_lea.vmem %s4878_s3, %s4308_s27  ;;  %s771_s19 = scalar_lea.vmem %s4879_s5, %s4308_s27  ;;  %787 = vst [vmem:[#allocation2 + $0x10] sm:$0xff] (!%p3073_p5), %v783_v2  ;;  %788 = vst [vmem:[#allocation2 + $0x18] sm:$0xff] (!%p3073_p5), %v784_v3 }
  0xd2   : > { %s774_s2 = scalar_lea.vmem %s4880_s16, %s4308_s27 }
  0xd6 PF: > { %v3522_v4 = vld [vmem:[%s4292_s6 + $0x4] ss:$12 sps:$4 sm:$0xff]   ;;  %v3524_v5 = vld [vmem:[%s4292_s6] ss:$12 sps:$4 sm:$0xff]   ;;  %v3943_v6 = vmov 0   ;;  %v3944_v27 = vmov 0.0   ;;  %v829_v29 = vlaneseq  ;;  %s4881_s28 = scalar_lea.vmem %s4803_s4, %s4308_s27  ;;  %s4884_s26 = scalar_lea.vmem %s4807_s8, %s4308_s27 }
  0xd7   : > { %1004 = vmatprep.mubr.bf16.mxu0 %v3943_v6  ;;  %972 = vmatprep.subr.bf16.mxu0 %v3522_v4  ;;  %v3525_v7 = vld [vmem:[%s4292_s6 + $0x1c] ss:$12 sps:$4 sm:$0xff]   ;;  %v3527_v8 = vld [vmem:[%s4292_s6 + $0x18] ss:$12 sps:$4 sm:$0xff]   ;;  %v3528_v9 = vld [vmem:[%s4292_s6 + $0x34] ss:$12 sps:$4 sm:$0xff]  }
  0xd8   : > { %973 = vmatpush1.bf16.msra.mxu0 %v3524_v5  ;;  %v3530_v10 = vld [vmem:[%s4292_s6 + $0x30] ss:$12 sps:$4 sm:$0xff]   ;;  %v3531_v11 = vld [vmem:[%s4292_s6 + $0x4c] ss:$12 sps:$4 sm:$0xff]   ;;  %v789_v12 = vld [vmem:[#allocation2] sm:$0xff]  ;;  %vm3945_vm0 = vmmov 0  }
  0xd9   : > { %974 = vmatprep.subr.bf16.mxu0 %v3525_v7  ;;  %v3533_v13 = vld [vmem:[%s4292_s6 + $0x48] ss:$12 sps:$4 sm:$0xff]   ;;  %v3534_v15 = vld [vmem:[%s4292_s6 + $0x64] ss:$12 sps:$4 sm:$0xff]   ;;  %v3536_v17 = vld [vmem:[%s4292_s6 + $0x60] ss:$12 sps:$4 sm:$0xff]  }
  0xda   : > { %v790_v14 = vld [vmem:[#allocation2 + $0x8] sm:$0xff]  ;;  %v3539_v19 = vld [vmem:[%s4292_s6 + $0x78] ss:$12 sps:$4 sm:$0xff]   ;;  %v3540_v20 = vld [vmem:[%s4292_s6 + $0x94] ss:$12 sps:$4 sm:$0xff]   ;;  %v4374_v30 = vshrl.u32 %v829_v29, 7 }
  0xdb   : > { %v793_v16 = vpack.c.bf16 %v790_v14, %v789_v12  ;;  %v3537_v18 = vld [vmem:[%s4292_s6 + $0x7c] ss:$12 sps:$4 sm:$0xff]   ;;  %v3543_v22 = vld [vmem:[%s4292_s6 + $0xac] ss:$12 sps:$4 sm:$0xff]   ;;  %v791_v24 = vld [vmem:[#allocation2 + $0x10] sm:$0xff]  ;;  %vm1078_vm1 = vcmask 261120  }
  0xdc   : > { %975 = vmatpush1.bf16.msra.mxu0 %v3527_v8  ;;  %v3542_v21 = vld [vmem:[%s4292_s6 + $0x90] ss:$12 sps:$4 sm:$0xff]   ;;  %v3545_v23 = vld [vmem:[%s4292_s6 + $0xa8] ss:$12 sps:$4 sm:$0xff]   ;;  %v831_v31 = vsub.s32 0, %v4374_v30  ;;  %v835_v33 = vsub.s32 1, %v4374_v30 }
  0xdd   : > { %976 = vmatprep.subr.bf16.mxu0 %v3528_v9  ;;  %3266 = vmatprep.mubr.bf16.mxu1 %v793_v16  ;;  %v792_v25 = vld [vmem:[#allocation2 + $0x18] sm:$0xff]  ;;  %v3546_v28 = vld [vmem:[%s4292_s6 + $0x8] ss:$12 sps:$4 sm:$0xff]   ;;  %v4378_v32 = vld [vmem:[%s4323_s11] sm:$0x7]  ;;  %s3946_s0 = smov 96  }
  0xde   : > { %v4367_v26 = vpack.c.bf16 %v792_v25, %v791_v24  ;;  %3250 = vmatprep.subr.bf16.mxu1 %v3546_v28  ;;  %v832_v34 = vrot.slane %v4378_v32, %v831_v31  ;;  %v836_v36 = vrot.slane %v4378_v32, %v835_v33  ;;  %v3547_v42 = vld [vmem:[%s4292_s6 + $0x20] ss:$12 sps:$4 sm:$0xff]   ;;  %v3548_v43 = vld [vmem:[%s4292_s6 + $0x38] ss:$12 sps:$4 sm:$0xff]   ;;  %v3549_v48 = vld [vmem:[%s4292_s6 + $0x50] ss:$12 sps:$4 sm:$0xff]  }
  0xdf   : > { %3251 = vmatpush3.bf16.msra.mxu1 %v3546_v28  ;;  %v3550_v56 = vld [vmem:[%s4292_s6 + $0x68] ss:$12 sps:$4 sm:$0xff]   ;;  %v3551_v61 = vld [vmem:[%s4292_s6 + $0x80] ss:$12 sps:$4 sm:$0xff]   ;;  %v3552_v63 = vld [vmem:[%s4292_s6 + $0x98] ss:$12 sps:$4 sm:$0xff]  }
  0xe0   : > { %977 = vmatpush1.bf16.msra.mxu0 %v3530_v10  ;;  %3252 = vmatprep.subr.bf16.mxu1 %v3547_v42  ;;  %v3553_v0 = vld [vmem:[%s4292_s6 + $0xb0] ss:$12 sps:$4 sm:$0xff]   ;;  %vm1173_vm2 = vcmask 130048   ;;  %v839_v14 = vsub.s32 2, %v4374_v30  ;;  %s3947_s3 = smov 64   ;;  %s3948_s6 = smov 32  }
  0xe1   : > { %978 = vmatprep.subr.bf16.mxu0 %v3531_v11  ;;  %vm2110_vm3 = vcmask 523264   ;;  %vm2115_vm4 = vcmask 785408   ;;  %p3160_p11 = scmp.ne.s32.totalorder %s3922_s21, 1 }
  0xe2   : > { %s4887_s21 = sld [smem:[#allocation35_spill]] (!%p3160_p11)  ;;  %s4888_s30 = sld [smem:[#allocation36_spill]] (!%p3160_p11) }
  0xe3   : > { %3253 = vmatpush3.bf16.msra.mxu1 %v3547_v42 }
  0xe4   : > { %979 = vmatpush1.bf16.msra.mxu0 %v3533_v13  ;;  %3254 = vmatprep.subr.bf16.mxu1 %v3548_v43 }
  0xe5   : > { %980 = vmatprep.subr.bf16.mxu0 %v3534_v15 }
  0xe7   : > { %3255 = vmatpush3.bf16.msra.mxu1 %v3548_v43 }
  0xe8   : > { %981 = vmatpush1.bf16.msra.mxu0 %v3536_v17  ;;  %3256 = vmatprep.subr.bf16.mxu1 %v3549_v48  ;;  %v840_v17 = vrot.slane %v4378_v32, %v839_v14 }
  0xe9   : > { %982 = vmatprep.subr.bf16.mxu0 %v3537_v18 }
  0xeb   : > { %3257 = vmatpush3.bf16.msra.mxu1 %v3549_v48 }
  0xec   : > { %983 = vmatpush1.bf16.msra.mxu0 %v3539_v19  ;;  %3258 = vmatprep.subr.bf16.mxu1 %v3550_v56 }
  0xed   : > { %984 = vmatprep.subr.bf16.mxu0 %v3540_v20 }
  0xef   : > { %3259 = vmatpush3.bf16.msra.mxu1 %v3550_v56 }
  0xf0   : > { %985 = vmatpush1.bf16.msra.mxu0 %v3542_v21  ;;  %3260 = vmatprep.subr.bf16.mxu1 %v3551_v61 }
  0xf1   : > { %986 = vmatprep.subr.bf16.mxu0 %v3543_v22 }
  0xf3   : > { %3261 = vmatpush3.bf16.msra.mxu1 %v3551_v61 }
  0xf4   : > { %987 = vmatpush1.bf16.msra.mxu0 %v3545_v23  ;;  %3262 = vmatprep.subr.bf16.mxu1 %v3552_v63 }
  0xf5   : > { %3270 = vmatprep.subr.bf16.mxu0 %v3944_v27 }
  0xf7   : > { %1005 = vmatmul.mubr.bf16.vlgmr.msra.gmra.mrb[0].mxu0 %v793_v16  ;;  %3263 = vmatpush3.bf16.msra.mxu1 %v3552_v63 }
  0xf8   : > { %1014 = vmatprep.mubr.bf16.mxu0 %v3943_v6  ;;  %3264 = vmatprep.subr.bf16.mxu1 %v3553_v0 }
  0xfb   : > { %3265 = vmatpush3.bf16.msra.mxu1 %v3553_v0 }
  0xfc   : > { %3282 = vmatprep.subr.bf16.mxu1 %v3944_v27 }
  0xfe   : > { %3267 = vmatmul.mubr.bf16.vlgmr.msra.gmra.mrb[0].mxu1 %v4367_v26 }
  0xff   : > { %1015 = vmatmul.mubr.bf16.gmra.mrb[4].mxu0 %v4367_v26  ;;  %3284 = vmatprep.mubr.msk.bf16.mxu1 %vm3945_vm0, %v3944_v27 }
 0x100   : > { %3272 = vmatprep.mubr.msk.bf16.mxu0 %vm3945_vm0, %v3944_v27 }
 0x1ca   : > { %v1006_v35 = vpop.f32.mrb[0].mxu0 }
 0x1cb   : > { %v1008_v37 = vpop.f32.mrb[1].mxu0  ;;  %v1007_v39 = vadd.f32 %v1006_v35, %v832_v34 }
 0x1cc   : > { %v1010_v38 = vpop.f32.mrb[2].mxu0  ;;  %v1009_v44 = vadd.f32 %v1008_v37, %v836_v36 }
 0x1cd   : > { %v1011_v40 = vadd.f32 %v1010_v38, %v832_v34  ;;  %v1012_v41 = vpop.f32.mrb[3].mxu0 }
 0x1ce   : > { %v1013_v45 = vadd.f32 %v1012_v41, %v836_v36 }
 0x1cf   : > { %v4389_v46 = vpack.c.bf16 %v1011_v40, %v1007_v39 }
 0x1d0   : > { %v4391_v47 = vpack.c.bf16 %v1013_v45, %v1009_v44 }
 0x1d1   : > { %v3268_v15 = vpop.f32.mrb[0].mxu1 }
 0x1d2   : > { %v1016_v49 = vpop.f32.mrb[4].mxu0  ;;  %v1083_v50 = vsel %vm1078_vm1, %v4391_v47, 0  ;;  %v1059_v16 = vpop.f32.mrb[1].mxu1  ;;  %v1068_v20 = vadd.f32 %v3268_v15, %v840_v17 }
 0x1d3   : > { %v1018_v51 = vpop.f32.mrb[5].mxu0  ;;  %3271 = vmatpush3.bf16.xpose.msra.mxu0 %v1083_v50  ;;  %v1017_v53 = vadd.f32 %v1016_v49, %v832_v34  ;;  %v3269_v18 = vpop.f32.mrb[2].mxu1  ;;  %v1060_v21 = vadd.f32 %v1059_v16, %v840_v17 }
 0x1d4   : > { %v1020_v52 = vpop.f32.mrb[6].mxu0  ;;  %3276 = vmatprep.subr.bf16.mxu0 %v3944_v27  ;;  %v1019_v57 = vadd.f32 %v1018_v51, %v836_v36  ;;  %v1062_v19 = vpop.f32.mrb[3].mxu1  ;;  %v1071_v22 = vadd.f32 %v3269_v18, %v840_v17 }
 0x1d5   : > { %v1021_v54 = vadd.f32 %v1020_v52, %v832_v34  ;;  %v1022_v55 = vpop.f32.mrb[7].mxu0  ;;  %v1063_v23 = vadd.f32 %v1062_v19, %v840_v17 }
 0x1d6   : > { %v1023_v58 = vadd.f32 %v1022_v55, %v836_v36  ;;  %v4428_v24 = vpack.c.bf16 %v1071_v22, %v1068_v20 }
 0x1d7   : > { %v4398_v59 = vpack.c.bf16 %v1021_v54, %v1017_v53  ;;  %v4430_v25 = vpack.c.bf16 %v1063_v23, %v1060_v21 }
 0x1d8   : > { %v4400_v60 = vpack.c.bf16 %v1023_v58, %v1019_v57 }
 0x1d9   : > { %3283 = vmatpush3.bf16.msra.mxu1 %v4430_v25 }
 0x1da   : > { %3273 = vmatmul.mubr.msk.bf16.vlgmr.msra.gmra.mrb[8].mxu0 %vm1078_vm1, %v4389_v46  ;;  %v1130_v62 = vsel %vm1078_vm1, %v4400_v60, 0  ;;  %1371 = vrot.lane.b32.xlu1 %v4400_v60, %s3946_s0 }
 0x1db   : > { %3277 = vmatpush3.bf16.xpose.msra.mxu0 %v1130_v62  ;;  %3278 = vmatprep.mubr.msk.bf16.mxu0 %vm3945_vm0, %v3944_v27 }
 0x1dc   : > { %3288 = vmatprep.subr.bf16.mxu0 %v3944_v27  ;;  %3294 = vmatprep.subr.bf16.mxu1 %v3944_v27 }
 0x1e2   : > { %3279 = vmatmul.mubr.msk.bf16.vlgmr.msra.gmra.mrb[12].mxu0 %vm1078_vm1, %v4398_v59 }
 0x1e3   : > { %3290 = vmatprep.mubr.msk.bf16.mxu0 %vm3945_vm0, %v3944_v27  ;;  %3289 = vmatpush3.bf16.msra.mxu0 %v4428_v24 }
 0x1e4   : > { %3300 = vmatprep.subr.bf16.mxu0 %v3944_v27 }
 0x24c   : > { %v1372_v29 = vpop.permute.xlu1 %1371 }
 0x24d   : > { %v1377_v54 = vsel %vm1078_vm1, %v1372_v29, 0 }
 0x2ad   : > { %v1119_v1 = vpop.f32.mrb[8].mxu0 }
 0x2ae   : > { %v3274_v2 = vpop.f32.mrb[9].mxu0  ;;  %v1174_v3 = vsel %vm1173_vm2, %v1119_v1, -inf }
 0x2af   : > { %1175 = vmax.xlane.f32.xlu0 %v1174_v3  ;;  %v1122_v4 = vpop.f32.mrb[10].mxu0 }
 0x2b0   : > { %v3275_v5 = vpop.f32.mrb[11].mxu0  ;;  %v1177_v7 = vsel %vm1173_vm2, %v1122_v4, -inf }
 0x2b3   : > { %1178 = vmax.xlane.f32.xlu0 %v1177_v7 }
 0x2b5   : > { %v1166_v8 = vpop.f32.mrb[12].mxu0 }
 0x2b6   : > { %v3280_v9 = vpop.f32.mrb[13].mxu0  ;;  %v1180_v10 = vsel %vm1173_vm2, %v1166_v8, -inf }
 0x2b7   : > { %1181 = vmax.xlane.f32.xlu1 %v1180_v10  ;;  %v1169_v11 = vpop.f32.mrb[14].mxu0 }
 0x2b8   : > { %v3281_v12 = vpop.f32.mrb[15].mxu0  ;;  %v1183_v13 = vsel %vm1173_vm2, %v1169_v11, -inf }
 0x2bb   : > { %1184 = vmax.xlane.f32.xlu1 %v1183_v13 }
 0x2c9   : > { %1318 = vrot.lane.b32.xlu0 %v4391_v47, %s3946_s0 }
 0x2cc   : > { %1315 = vrot.lane.b32.xlu1 %v4389_v46, %s3946_s0 }
 0x2d0   : > { %1368 = vrot.lane.b32.xlu1 %v4398_v59, %s3946_s0 }
 0x33c   : > { %v1176_v26 = vpop.xlane.xlu0 %1175 }
 0x33d   : > { %v1186_v28 = vsub.f32 %v1119_v1, %v1176_v26 }
 0x33f   : > { %v1190_v32 = vmul.f32 1.442695, %v1186_v28 }
 0x340   : > { %v1179_v34 = vpop.xlane.xlu0 %1178 }
 0x341   : > { %v1187_v35 = vsub.f32 %v1122_v4, %v1179_v34  ;;  %3602 = vpow2.f32 %v1190_v32 }
 0x343   : > { %v1192_v36 = vmul.f32 1.442695, %v1187_v35 }
 0x344   : > { %v1182_v37 = vpop.xlane.xlu1 %1181  ;;  %v1319_v45 = vpop.permute.xlu0 %1318 }
 0x345   : > { %3604 = vpow2.f32 %v1192_v36  ;;  %v1188_v38 = vsub.f32 %v1166_v8, %v1182_v37  ;;  %v1324_v49 = vsel %vm1078_vm1, %v1319_v45, 0 }
 0x347   : > { %v1194_v39 = vmul.f32 1.442695, %v1188_v38 }
 0x348   : > { %v1185_v40 = vpop.xlane.xlu1 %1184 }
 0x349   : > { %v1189_v41 = vsub.f32 %v1169_v11, %v1185_v40  ;;  %3606 = vpow2.f32 %v1194_v39 }
 0x34b   : > { %v1196_v42 = vmul.f32 1.442695, %v1189_v41  ;;  %v4442_v43 = vpop.eup %3602 }
 0x34c   : > { %v1316_v53 = vpop.permute.xlu1 %1315 }
 0x34d   : > { %3608 = vpow2.f32 %v1196_v42 }
 0x34f   : > { %v4444_v44 = vpop.eup %3604 }
 0x350   : > { %v1210_v48 = vpack.c.bf16 %v4444_v44, %v4442_v43  ;;  %v1369_v55 = vpop.permute.xlu1 %1368 }
 0x352   : > { %3285 = vmatmul.mubr.msk.bf16.vlgmr.msra.gmra.mrb[4].mxu1 %vm1173_vm2, %v1210_v48 }
 0x353   : > { %3295 = vmatpush3.bf16.xpose.msra.mxu1 %v1324_v49  ;;  %3296 = vmatprep.mubr.msk.bf16.mxu1 %vm3945_vm0, %v3944_v27  ;;  %v4453_v50 = vpop.eup %3606 }
 0x354   : > { %3306 = vmatprep.subr.bf16.mxu1 %v3944_v27 }
 0x357   : > { %v4455_v51 = vpop.eup %3608 }
 0x358   : > { %v1211_v52 = vpack.c.bf16 %v4455_v51, %v4453_v50 }
 0x35a   : > { %3291 = vmatmul.mubr.msk.bf16.vlgmr.msra.gmra.mrb[16].mxu0 %vm1173_vm2, %v1211_v52  ;;  %3297 = vmatmul.mubr.msk.bf16.vlgmr.msra.gmra.mrb[8].mxu1 %vm1078_vm1, %v1316_v53 }
 0x35b   : > { %3301 = vmatpush3.bf16.xpose.msra.mxu0 %v1377_v54  ;;  %3302 = vmatprep.mubr.msk.bf16.mxu0 %vm3945_vm0, %v3944_v27 }
 0x35c   : > { %3312 = vmatprep.subr.bf16.mxu0 %v3944_v27  ;;  %3308 = vmatprep.mubr.msk.bf16.mxu1 %vm3945_vm0, %v3944_v27 }
 0x362   : > { %3303 = vmatmul.mubr.msk.bf16.vlgmr.msra.gmra.mrb[20].mxu0 %vm1078_vm1, %v1369_v55 }
 0x363   : > { %3314 = vmatprep.mubr.msk.bf16.mxu0 %vm3945_vm0, %v3944_v27 }
 0x425   : > { %v4470_v56 = vpop.f32.mrb[4].mxu1 }
 0x426   : > { %v3286_v57 = vpop.f32.mrb[5].mxu1 }
 0x427   : > { %v4472_v58 = vpop.f32.mrb[6].mxu1 }
 0x428   : > { %v3287_v61 = vpop.f32.mrb[7].mxu1 }
 0x42d   : > { %v4474_v62 = vpop.f32.mrb[16].mxu0  ;;  %v1360_v63 = vpop.f32.mrb[8].mxu1 }
 0x42e   : > { %v3292_v0 = vpop.f32.mrb[17].mxu0  ;;  %v3298_v1 = vpop.f32.mrb[9].mxu1  ;;  %v1420_v2 = vsel %vm1173_vm2, %v1360_v63, -inf }
 0x42f   : > { %1421 = vmax.xlane.f32.xlu0 %v1420_v2  ;;  %v4477_v3 = vpop.f32.mrb[18].mxu0  ;;  %v1363_v4 = vpop.f32.mrb[10].mxu1 }
 0x430   : > { %v3293_v5 = vpop.f32.mrb[19].mxu0  ;;  %v3299_v7 = vpop.f32.mrb[11].mxu1  ;;  %v1423_v8 = vsel %vm1173_vm2, %v1363_v4, -inf }
 0x431   : > { %1424 = vmax.xlane.f32.xlu1 %v1423_v8 }
 0x435   : > { %v1413_v9 = vpop.f32.mrb[20].mxu0 }
 0x436   : > { %v3304_v10 = vpop.f32.mrb[21].mxu0  ;;  %v1426_v11 = vsel %vm1173_vm2, %v1413_v9, -inf }
 0x437   : > { %1427 = vmax.xlane.f32.xlu0 %v1426_v11  ;;  %v1416_v12 = vpop.f32.mrb[22].mxu0 }
 0x438   : > { %v3305_v13 = vpop.f32.mrb[23].mxu0  ;;  %v1429_v14 = vsel %vm1173_vm2, %v1416_v12, -inf }
 0x43b   : > { %1430 = vmax.xlane.f32.xlu0 %v1429_v14 }
 0x442   : > { %1507 = vrot.lane.b32.xlu1 %v4428_v24, %s3946_s0 }
 0x446   : > { %1568 = vrot.lane.b32.xlu1 %v4391_v47, %s3947_s3 }
 0x44a   : > { %1619 = vrot.lane.b32.xlu1 %v4400_v60, %s3947_s3 }
 0x44e   : > { %1617 = vrot.lane.b32.xlu1 %v4398_v59, %s3947_s3 }
 0x451   : > { %1459 = vrot.lane.b32.xlu0 %v4430_v25, %s3946_s0 }
 0x455   : > { %1566 = vrot.lane.b32.xlu0 %v4389_v46, %s3947_s3 }
 0x4bc   : > { %v1422_v15 = vpop.xlane.xlu0 %1421 }
 0x4bd   : > { %v1432_v16 = vsub.f32 %v1360_v63, %v1422_v15 }
 0x4be   : > { %v1425_v17 = vpop.xlane.xlu1 %1424 }
 0x4bf   : > { %v1436_v18 = vmul.f32 1.442695, %v1432_v16  ;;  %v1433_v19 = vsub.f32 %v1363_v4, %v1425_v17 }
 0x4c1   : > { %v1438_v20 = vmul.f32 1.442695, %v1433_v19  ;;  %3610 = vpow2.f32 %v1436_v18 }
 0x4c2   : > { %v1508_v21 = vpop.permute.xlu1 %1507 }
 0x4c3   : > { %3612 = vpow2.f32 %v1438_v20  ;;  %3313 = vmatpush3.bf16.msra.mxu0 %v1508_v21 }
 0x4c4   : > { %v1428_v22 = vpop.xlane.xlu0 %1427  ;;  %3324 = vmatprep.subr.bf16.mxu0 %v3944_v27 }
 0x4c5   : > { %v1434_v23 = vsub.f32 %v1413_v9, %v1428_v22 }
 0x4c6   : > { %v1569_v38 = vpop.permute.xlu1 %1568 }
 0x4c7   : > { %v1440_v26 = vmul.f32 1.442695, %v1434_v23  ;;  %v1574_v39 = vsel %vm1078_vm1, %v1569_v38, 0 }
 0x4c8   : > { %v1431_v28 = vpop.xlane.xlu0 %1430 }
 0x4c9   : > { %v1435_v29 = vsub.f32 %v1416_v12, %v1431_v28  ;;  %3614 = vpow2.f32 %v1440_v26 }
 0x4ca   : > { %v1620_v42 = vpop.permute.xlu1 %1619 }
 0x4cb   : > { %v1442_v32 = vmul.f32 1.442695, %v1435_v29  ;;  %v4495_v34 = vpop.eup %3610  ;;  %v1625_v48 = vsel %vm1078_vm1, %v1620_v42, 0 }
 0x4cc   : > { %v1460_v35 = vpop.permute.xlu0 %1459 }
 0x4cd   : > { %v4497_v36 = vpop.eup %3612  ;;  %3616 = vpow2.f32 %v1442_v32  ;;  %3307 = vmatpush3.bf16.msra.mxu1 %v1460_v35 }
 0x4ce   : > { %v1456_v37 = vpack.c.bf16 %v4497_v36, %v4495_v34  ;;  %3318 = vmatprep.subr.bf16.mxu1 %v3944_v27  ;;  %v1618_v52 = vpop.permute.xlu1 %1617 }
 0x4d0   : > { %3309 = vmatmul.mubr.msk.bf16.vlgmr.msra.gmra.mrb[12].mxu1 %vm1173_vm2, %v1456_v37  ;;  %v1567_v49 = vpop.permute.xlu0 %1566 }
 0x4d1   : > { %3320 = vmatprep.mubr.msk.bf16.mxu1 %vm3945_vm0, %v3944_v27 }
 0x4d3   : > { %v4506_v40 = vpop.eup %3614 }
 0x4d6   : > { %3319 = vmatpush3.bf16.xpose.msra.mxu1 %v1574_v39 }
 0x4d7   : > { %v4508_v41 = vpop.eup %3616  ;;  %3330 = vmatprep.subr.bf16.mxu1 %v3944_v27 }
 0x4d8   : > { %v1457_v45 = vpack.c.bf16 %v4508_v41, %v4506_v40 }
 0x4da   : > { %3315 = vmatmul.mubr.msk.bf16.vlgmr.msra.gmra.mrb[24].mxu0 %vm1173_vm2, %v1457_v45 }
 0x4db   : > { %3325 = vmatpush3.bf16.xpose.msra.mxu0 %v1625_v48  ;;  %3326 = vmatprep.mubr.msk.bf16.mxu0 %vm3945_vm0, %v3944_v27 }
 0x4dc   : > { %3336 = vmatprep.subr.bf16.mxu0 %v3944_v27 }
 0x4dd   : > { %3321 = vmatmul.mubr.msk.bf16.vlgmr.msra.gmra.mrb[16].mxu1 %vm1078_vm1, %v1567_v49 }
 0x4de   : > { %3332 = vmatprep.mubr.msk.bf16.mxu1 %vm3945_vm0, %v3944_v27 }
 0x4e2   : > { %3327 = vmatmul.mubr.msk.bf16.vlgmr.msra.gmra.mrb[28].mxu0 %vm1078_vm1, %v1618_v52 }
 0x4e3   : > { %3338 = vmatprep.mubr.msk.bf16.mxu0 %vm3945_vm0, %v3944_v27 }
 0x5a3   : > { %v4524_v53 = vpop.f32.mrb[12].mxu1 }
 0x5a4   : > { %v3310_v54 = vpop.f32.mrb[13].mxu1 }
 0x5a5   : > { %v4526_v55 = vpop.f32.mrb[14].mxu1 }
 0x5a6   : > { %v3311_v57 = vpop.f32.mrb[15].mxu1 }
 0x5ad   : > { %v4528_v61 = vpop.f32.mrb[24].mxu0 }
 0x5ae   : > { %v3316_v63 = vpop.f32.mrb[25].mxu0 }
 0x5af   : > { %v4530_v0 = vpop.f32.mrb[26].mxu0 }
 0x5b0   : > { %v3317_v1 = vpop.f32.mrb[27].mxu0  ;;  %v1610_v2 = vpop.f32.mrb[16].mxu1 }
 0x5b1   : > { %v3322_v4 = vpop.f32.mrb[17].mxu1  ;;  %v1668_v5 = vsel %vm1173_vm2, %v1610_v2, -inf }
 0x5b2   : > { %1669 = vmax.xlane.f32.xlu0 %v1668_v5  ;;  %v1613_v7 = vpop.f32.mrb[18].mxu1 }
 0x5b3   : > { %v3323_v8 = vpop.f32.mrb[19].mxu1  ;;  %v1671_v9 = vsel %vm1173_vm2, %v1613_v7, -inf }
 0x5b4   : > { %1672 = vmax.xlane.f32.xlu1 %v1671_v9 }
 0x5b5   : > { %v1661_v10 = vpop.f32.mrb[28].mxu0 }
 0x5b6   : > { %v3328_v11 = vpop.f32.mrb[29].mxu0  ;;  %v1674_v12 = vsel %vm1173_vm2, %v1661_v10, -inf }
 0x5b7   : > { %1675 = vmax.xlane.f32.xlu0 %v1674_v12  ;;  %v1664_v13 = vpop.f32.mrb[30].mxu0 }
 0x5b8   : > { %v3329_v14 = vpop.f32.mrb[31].mxu0  ;;  %v1677_v15 = vsel %vm1173_vm2, %v1664_v13, -inf }
 0x5bb   : > { %1678 = vmax.xlane.f32.xlu0 %v1677_v15 }
 0x5c5   : > { %1753 = vrot.lane.b32.xlu1 %v4428_v24, %s3947_s3 }
 0x5c9   : > { %1814 = vrot.lane.b32.xlu1 %v4391_v47, %s3948_s6 }
 0x5cd   : > { %1865 = vrot.lane.b32.xlu1 %v4400_v60, %s3948_s6 }
 0x5d1   : > { %1863 = vrot.lane.b32.xlu1 %v4398_v59, %s3948_s6  ;;  %1706 = vrot.lane.b32.xlu0 %v4430_v25, %s3947_s3 }
 0x5d5   : > { %1812 = vrot.lane.b32.xlu0 %v4389_v46, %s3948_s6 }
 0x63f   : > { %v1670_v16 = vpop.xlane.xlu0 %1669 }
 0x640   : > { %v1680_v17 = vsub.f32 %v1610_v2, %v1670_v16 }
 0x641   : > { %v1673_v18 = vpop.xlane.xlu1 %1672 }
 0x642   : > { %v1684_v19 = vmul.f32 1.442695, %v1680_v17  ;;  %v1681_v20 = vsub.f32 %v1613_v7, %v1673_v18 }
 0x644   : > { %v1686_v21 = vmul.f32 1.442695, %v1681_v20  ;;  %v1676_v22 = vpop.xlane.xlu0 %1675  ;;  %3618 = vpow2.f32 %v1684_v19  ;;  %v1444_v20 = vsel %vm1173_vm2, %v4495_v34, 0.0 }
 0x645   : > { %v1682_v47 = vsub.f32 %v1661_v10, %v1676_v22  ;;  %v1754_v23 = vpop.permute.xlu1 %1753  ;;  %v1447_v22 = vsel %vm1173_vm2, %v4497_v36, 0.0 }
 0x646   : > { %3620 = vpow2.f32 %v1686_v21  ;;  %3337 = vmatpush3.bf16.msra.mxu0 %v1754_v23  ;;  %v1453_v21 = vsel %vm1173_vm2, %v4508_v41, 0.0 }
 0x647   : > { %3348 = vmatprep.subr.bf16.mxu0 %v3944_v27  ;;  %v1688_v59 = vmul.f32 1.442695, %v1682_v47 }
 0x648   : > { %v1679_v60 = vpop.xlane.xlu0 %1678 }
 0x649   : > { %v1683_v26 = vsub.f32 %v1664_v13, %v1679_v60  ;;  %3622 = vpow2.f32 %v1688_v59  ;;  %v1815_v35 = vpop.permute.xlu1 %1814 }
 0x64a   : > { %v1820_v38 = vsel %vm1078_vm1, %v1815_v35, 0 }
 0x64b   : > { %v1690_v28 = vmul.f32 1.442695, %v1683_v26 }
 0x64c   : > { %v1707_v46 = vpop.permute.xlu0 %1706 }
 0x64d   : > { %3624 = vpow2.f32 %v1690_v28  ;;  %3331 = vmatpush3.bf16.msra.mxu1 %v1707_v46  ;;  %v1866_v45 = vpop.permute.xlu1 %1865 }
 0x64e   : > { %3342 = vmatprep.subr.bf16.mxu1 %v3944_v27  ;;  %v3619_v29 = vpop.eup %3618  ;;  %v1871_v49 = vsel %vm1078_vm1, %v1866_v45, 0 }
 0x64f   : > { %v1692_v34 = vsel %vm1173_vm2, %v3619_v29, 0.0 }
 0x650   : > { %v3621_v32 = vpop.eup %3620  ;;  %v1813_v52 = vpop.permute.xlu0 %1812 }
 0x651   : > { %v1704_v37 = vpack.c.bf16 %v3621_v32, %v3619_v29  ;;  %v1864_v54 = vpop.permute.xlu1 %1863  ;;  %v1695_v47 = vsel %vm1173_vm2, %v3621_v32, 0.0 }
 0x653   : > { %3333 = vmatmul.mubr.msk.bf16.vlgmr.msra.gmra.mrb[20].mxu1 %vm1173_vm2, %v1704_v37  ;;  %v3623_v39 = vpop.eup %3622 }
 0x654   : > { %3344 = vmatprep.mubr.msk.bf16.mxu1 %vm3945_vm0, %v3944_v27  ;;  %v1698_v41 = vsel %vm1173_vm2, %v3623_v39, 0.0 }
 0x656   : > { %3343 = vmatpush3.bf16.xpose.msra.mxu1 %v1820_v38 }
 0x657   : > { %v3625_v42 = vpop.eup %3624  ;;  %3354 = vmatprep.subr.bf16.mxu1 %v3944_v27 }
 0x658   : > { %v1705_v48 = vpack.c.bf16 %v3625_v42, %v3623_v39 }
 0x65a   : > { %3339 = vmatmul.mubr.msk.bf16.vlgmr.msra.gmra.mrb[32].mxu0 %vm1173_vm2, %v1705_v48 }
 0x65b   : > { %3349 = vmatpush3.bf16.xpose.msra.mxu0 %v1871_v49  ;;  %3350 = vmatprep.mubr.msk.bf16.mxu0 %vm3945_vm0, %v3944_v27 }
 0x65c   : > { %3360 = vmatprep.subr.bf16.mxu0 %v3944_v27 }
 0x65d   : > { %3345 = vmatmul.mubr.msk.bf16.vlgmr.msra.gmra.mrb[24].mxu1 %vm1078_vm1, %v1813_v52 }
 0x65e   : > { %3356 = vmatprep.mubr.msk.bf16.mxu1 %vm3945_vm0, %v3944_v27 }
 0x662   : > { %3351 = vmatmul.mubr.msk.bf16.vlgmr.msra.gmra.mrb[36].mxu0 %vm1078_vm1, %v1864_v54 }
 0x663   : > { %3362 = vmatprep.mubr.msk.bf16.mxu0 %vm3945_vm0, %v3944_v27 }
 0x726   : > { %v4566_v57 = vpop.f32.mrb[20].mxu1 }
 0x727   : > { %v3334_v63 = vpop.f32.mrb[21].mxu1 }
 0x728   : > { %v4568_v1 = vpop.f32.mrb[22].mxu1 }
 0x729   : > { %v3335_v2 = vpop.f32.mrb[23].mxu1 }
 0x72d   : > { %v4570_v4 = vpop.f32.mrb[32].mxu0 }
 0x72e   : > { %v3340_v5 = vpop.f32.mrb[33].mxu0 }
 0x72f   : > { %v4572_v7 = vpop.f32.mrb[34].mxu0  ;;  %v1198_v5 = vsel %vm1173_vm2, %v4442_v43, 0.0  ;;  %v1207_v43 = vsel %vm1173_vm2, %v4455_v51, 0.0 }
 0x730   : > { %v3341_v8 = vpop.f32.mrb[35].mxu0  ;;  %v1856_v9 = vpop.f32.mrb[24].mxu1 }
 0x731   : > { %v3346_v10 = vpop.f32.mrb[25].mxu1  ;;  %v1914_v11 = vsel %vm1173_vm2, %v1856_v9, -inf }
 0x732   : > { %1915 = vmax.xlane.f32.xlu0 %v1914_v11  ;;  %v1859_v12 = vpop.f32.mrb[26].mxu1  ;;  %v1204_v10 = vsel %vm1173_vm2, %v4453_v50, 0.0  ;;  %v1201_v11 = vsel %vm1173_vm2, %v4444_v44, 0.0 }
 0x733   : > { %v3347_v13 = vpop.f32.mrb[27].mxu1  ;;  %v1917_v27 = vsel %vm1173_vm2, %v1859_v12, -inf }
 0x734   : > { %1918 = vmax.xlane.f32.xlu1 %v1917_v27 }
 0x735   : > { %v1907_v14 = vpop.f32.mrb[36].mxu0 }
 0x736   : > { %v3352_v15 = vpop.f32.mrb[37].mxu0  ;;  %v1920_v16 = vsel %vm1173_vm2, %v1907_v14, -inf }
 0x737   : > { %1921 = vmax.xlane.f32.xlu0 %v1920_v16  ;;  %v1910_v17 = vpop.f32.mrb[38].mxu0 }
 0x738   : > { %v3353_v18 = vpop.f32.mrb[39].mxu0  ;;  %v1923_v19 = vsel %vm1173_vm2, %v1910_v17, -inf }
 0x73b   : > { %1924 = vmax.xlane.f32.xlu0 %v1923_v19 }
 0x745   : > { %1999 = vrot.lane.b32.xlu1 %v4428_v24, %s3948_s6  ;;  %v1450_v24 = vsel %vm1173_vm2, %v4506_v40, 0.0 }
 0x751   : > { %1952 = vrot.lane.b32.xlu0 %v4430_v25, %s3948_s6  ;;  %v1701_v25 = vsel %vm1173_vm2, %v3625_v42, 0.0 }
 0x769   : > { %1445 = vadd.xlane.f32.xlu1 %v1444_v20 }
 0x76d   : > { %1454 = vadd.xlane.f32.xlu1 %v1453_v21 }
 0x770   : > { %1448 = vadd.xlane.f32.xlu0 %v1447_v22 }
 0x771   : > { %1696 = vadd.xlane.f32.xlu1 %v1695_v47 }
 0x774   : > { %1451 = vadd.xlane.f32.xlu0 %v1450_v24 }
 0x775   : > { %1702 = vadd.xlane.f32.xlu1 %v1701_v25 }
 0x778   : > { %1693 = vadd.xlane.f32.xlu0 %v1692_v34 }
 0x77c   : > { %1699 = vadd.xlane.f32.xlu0 %v1698_v41 }
 0x7bf   : > { %v1916_v23 = vpop.xlane.xlu0 %1915 }
 0x7c0   : > { %v1926_v59 = vsub.f32 %v1856_v9, %v1916_v23 }
 0x7c1   : > { %v1919_v36 = vpop.xlane.xlu1 %1918 }
 0x7c2   : > { %v1930_v60 = vmul.f32 1.442695, %v1926_v59  ;;  %v1927_v26 = vsub.f32 %v1859_v12, %v1919_v36 }
 0x7c4   : > { %3626 = vpow2.f32 %v1930_v60  ;;  %v1932_v28 = vmul.f32 1.442695, %v1927_v26  ;;  %v1922_v46 = vpop.xlane.xlu0 %1921  ;;  %v3554_v26 = vld [vmem:[%s4298_s25] sm:$0xff]  }
 0x7c5   : > { %v1928_v32 = vsub.f32 %v1907_v14, %v1922_v46  ;;  %v2000_v40 = vpop.permute.xlu1 %1999  ;;  %v3558_v46 = vld [vmem:[%s4298_s25 + $0x20] sm:$0xff]  }
 0x7c6   : > { %3628 = vpow2.f32 %v1932_v28  ;;  %3361 = vmatpush3.bf16.msra.mxu0 %v2000_v40  ;;  %v3555_v28 = vld [vmem:[%s4298_s25 + $0x8] sm:$0xff]   ;;  %v3560_v40 = vld [vmem:[%s4298_s25 + $0x30] sm:$0xff]  }
 0x7c7   : > { %v1934_v35 = vmul.f32 1.442695, %v1928_v32  ;;  %v3559_v32 = vld [vmem:[%s4298_s25 + $0x28] sm:$0xff]  }
 0x7c8   : > { %v1925_v37 = vpop.xlane.xlu0 %1924 }
 0x7c9   : > { %3630 = vpow2.f32 %v1934_v35  ;;  %v1929_v29 = vsub.f32 %v1910_v17, %v1925_v37 }
 0x7cb   : > { %v1936_v38 = vmul.f32 1.442695, %v1929_v29 }
 0x7cc   : > { %v1953_v42 = vpop.permute.xlu0 %1952 }
 0x7cd   : > { %3632 = vpow2.f32 %v1936_v38  ;;  %3355 = vmatpush3.bf16.msra.mxu1 %v1953_v42 }
 0x7ce   : > { %v3627_v39 = vpop.eup %3626  ;;  %3366 = vmatprep.subr.bf16.mxu1 %v3554_v26 }
 0x7cf   : > { %v1938_v45 = vsel %vm1173_vm2, %v3627_v39, 0.0 }
 0x7d0   : > { %v3629_v48 = vpop.eup %3628  ;;  %1939 = vadd.xlane.f32.xlu0 %v1938_v45 }
 0x7d1   : > { %v1941_v49 = vsel %vm1173_vm2, %v3629_v48, 0.0  ;;  %v1950_v52 = vpack.c.bf16 %v3629_v48, %v3627_v39  ;;  %v3561_v39 = vld [vmem:[%s4298_s25 + $0x38] sm:$0xff]  }
 0x7d2   : > { %1942 = vadd.xlane.f32.xlu1 %v1941_v49 }
 0x7d3   : > { %v3631_v54 = vpop.eup %3630  ;;  %3357 = vmatmul.mubr.msk.bf16.vlgmr.msra.gmra.mrb[28].mxu1 %vm1173_vm2, %v1950_v52 }
 0x7d4   : > { %v1944_v63 = vsel %vm1173_vm2, %v3631_v54, 0.0  ;;  %3367 = vmatpush3.bf16.msra.mxu1 %v3554_v26 }
 0x7d5   : > { %1945 = vadd.xlane.f32.xlu0 %v1944_v63  ;;  %3368 = vmatprep.subr.bf16.mxu1 %v3555_v28 }
 0x7d7   : > { %v3633_v2 = vpop.eup %3632 }
 0x7d8   : > { %v1947_v8 = vsel %vm1173_vm2, %v3633_v2, 0.0  ;;  %v1951_v9 = vpack.c.bf16 %v3633_v2, %v3631_v54  ;;  %3369 = vmatpush3.bf16.msra.mxu1 %v3555_v28 }
 0x7d9   : > { %1199 = vadd.xlane.f32.xlu0 %v1198_v5  ;;  %1948 = vadd.xlane.f32.xlu1 %v1947_v8 }
 0x7da   : > { %3363 = vmatmul.mubr.msk.bf16.vlgmr.msra.gmra.mrb[40].mxu0 %vm1173_vm2, %v1951_v9 }
 0x7db   : > { %2455 = vmatprep.mubr.bf16.mxu0 %v3943_v6 }
 0x7dd   : > { %1205 = vadd.xlane.f32.xlu0 %v1204_v10  ;;  %1202 = vadd.xlane.f32.xlu1 %v1201_v11 }
 0x7e1   : > { %1208 = vadd.xlane.f32.xlu1 %v1207_v43 }
 0x7f6   : > { %v1446_v12 = vpop.xlane.xlu1 %1445 }
 0x7f7   : > { %3634 = vrcp.f32 %v1446_v12 }
 0x7fa   : > { %v1455_v13 = vpop.xlane.xlu1 %1454 }
 0x7fd   : > { %v1449_v27 = vpop.xlane.xlu0 %1448 }
 0x7fe   : > { %3636 = vrcp.f32 %v1449_v27  ;;  %v1697_v14 = vpop.xlane.xlu1 %1696 }
 0x7ff   : > { %3638 = vrcp.f32 %v1455_v13 }
 0x801   : > { %v1452_v15 = vpop.xlane.xlu0 %1451  ;;  %v3635_v17 = vpop.eup %3634 }
 0x802   : > { %3640 = vrcp.f32 %v1452_v15  ;;  %v1703_v50 = vpop.xlane.xlu1 %1702  ;;  %v1562_v51 = vmul.f32 %v3635_v17, %v4524_v53 }
 0x803   : > { %3642 = vrcp.f32 %v1697_v14 }
 0x805   : > { %v1694_v16 = vpop.xlane.xlu0 %1693 }
 0x806   : > { %3644 = vrcp.f32 %v1694_v16 }
 0x807   : > { %3646 = vrcp.f32 %v1703_v50 }
 0x808   : > { %v3637_v44 = vpop.eup %3636 }
 0x809   : > { %v1700_v18 = vpop.xlane.xlu0 %1699  ;;  %v1563_v19 = vmul.f32 %v3637_v44, %v4526_v55  ;;  %v3639_v20 = vpop.eup %3638 }
 0x80a   : > { %3648 = vrcp.f32 %v1700_v18  ;;  %v1565_v24 = vmul.f32 %v3639_v20, %v4530_v0 }
 0x80b   : > { %v3492_v21 = vpack.i.bf16 %v1563_v19, %v1562_v51 }
 0x80c   : > { %v3641_v22 = vpop.eup %3640 }
 0x80d   : > { %3493 = vrot.lane.b32.xlu0 %v3492_v21, %s3948_s6  ;;  %v1564_v47 = vmul.f32 %v3641_v22, %v4528_v61  ;;  %v3643_v25 = vpop.eup %3642 }
 0x80e   : > { %v1809_v55 = vmul.f32 %v3643_v25, %v4568_v1  ;;  %v3557_v1 = vld [vmem:[%s4298_s25 + $0x18] sm:$0xff]  }
 0x80f   : > { %v3497_v34 = vpack.i.bf16 %v1565_v24, %v1564_v47 }
 0x810   : > { %v3645_v41 = vpop.eup %3644 }
 0x811   : > { %3498 = vrot.lane.b32.xlu1 %v3497_v34, %s3948_s6  ;;  %v1808_v53 = vmul.f32 %v3645_v41, %v4566_v57  ;;  %v3647_v23 = vpop.eup %3646  ;;  %v3556_v57 = vld [vmem:[%s4298_s25 + $0x10] sm:$0xff]  }
 0x812   : > { %v1811_v0 = vmul.f32 %v3647_v23, %v4572_v7  ;;  %3370 = vmatprep.subr.bf16.mxu1 %v3556_v57 }
 0x813   : > { %v3502_v59 = vpack.i.bf16 %v1809_v55, %v1808_v53  ;;  %3371 = vmatpush3.bf16.msra.mxu1 %v3556_v57 }
 0x814   : > { %v3649_v36 = vpop.eup %3648  ;;  %3372 = vmatprep.subr.bf16.mxu1 %v3557_v1 }
 0x815   : > { %3503 = vrot.lane.b32.xlu1 %v3502_v59, %s3947_s3  ;;  %v1810_v61 = vmul.f32 %v3649_v36, %v4570_v4 }
 0x817   : > { %v3507_v60 = vpack.i.bf16 %v1811_v0, %v1810_v61  ;;  %3373 = vmatpush3.bf16.msra.mxu1 %v3557_v1 }
 0x818   : > { %3374 = vmatprep.subr.bf16.mxu1 %v3558_v46 }
 0x819   : > { %3508 = vrot.lane.b32.xlu1 %v3507_v60, %s3947_s3 }
 0x81b   : > { %3375 = vmatpush3.bf16.msra.mxu1 %v3558_v46 }
 0x81c   : > { %3376 = vmatprep.subr.bf16.mxu1 %v3559_v32 }
 0x81f   : > { %3377 = vmatpush3.bf16.msra.mxu1 %v3559_v32 }
 0x820   : > { %3378 = vmatprep.subr.bf16.mxu1 %v3560_v40 }
 0x823   : > { %3379 = vmatpush3.bf16.msra.mxu1 %v3560_v40 }
 0x824   : > { %3380 = vmatprep.subr.bf16.mxu1 %v3561_v39 }
 0x827   : > { %3381 = vmatpush3.bf16.msra.mxu1 %v3561_v39 }
 0x85d   : > { %v1940_v4 = vpop.xlane.xlu0 %1939 }
 0x85e   : > { %3650 = vrcp.f32 %v1940_v4 }
 0x85f   : > { %v1943_v7 = vpop.xlane.xlu1 %1942 }
 0x860   : > { %3652 = vrcp.f32 %v1943_v7 }
 0x862   : > { %v1946_v35 = vpop.xlane.xlu0 %1945 }
 0x863   : > { %3654 = vrcp.f32 %v1946_v35 }
 0x866   : > { %v1949_v37 = vpop.xlane.xlu1 %1948  ;;  %v1200_v14 = vpop.xlane.xlu0 %1199 }
 0x867   : > { %3656 = vrcp.f32 %v1949_v37 }
 0x868   : > { %v3651_v38 = vpop.eup %3650  ;;  %3658 = vrcp.f32 %v1200_v14  ;;  %v3562_v14 = vld [vmem:[%s4300_s23] ss:$8 sps:$4 sm:$0xff]  }
 0x86a   : > { %v3653_v45 = vpop.eup %3652  ;;  %v1203_v27 = vpop.xlane.xlu1 %1202 }
 0x86b   : > { %3660 = vrcp.f32 %v1203_v27  ;;  %v1206_v50 = vpop.xlane.xlu0 %1205 }
 0x86c   : > { %3662 = vrcp.f32 %v1206_v50  ;;  %v3567_v50 = vld [vmem:[%s4300_s23 + $0x14] ss:$8 sps:$4 sm:$0xff]  }
 0x86d   : > { %v3655_v5 = vpop.eup %3654 }
 0x86e   : > { %v1209_v15 = vpop.xlane.xlu1 %1208 }
 0x86f   : > { %3664 = vrcp.f32 %v1209_v15  ;;  %v3564_v15 = vld [vmem:[%s4300_s23 + $0x4] ss:$8 sps:$4 sm:$0xff]  }
 0x870   : > { %2423 = vmatprep.subr.bf16.mxu0 %v3564_v15 }
 0x871   : > { %v3657_v9 = vpop.eup %3656  ;;  %2424 = vmatpush1.bf16.msra.mxu0 %v3562_v14 }
 0x872   : > { %v3659_v44 = vpop.eup %3658  ;;  %2425 = vmatprep.subr.bf16.mxu0 %v3567_v50  ;;  %v3124_v50 = vld [vmem:[%s768_s7] ss:$0 sm:$0xff] }
 0x873   : > { %v1310_v47 = vmul.f32 %v3659_v44, %v4470_v56 }
 0x875   : > { %v3661_v51 = vpop.eup %3660 }
 0x876   : > { %v1311_v24 = vmul.f32 %v3661_v51, %v4472_v58  ;;  %v3663_v23 = vpop.eup %3662 }
 0x877   : > { %v1312_v4 = vmul.f32 %v3663_v23, %v4474_v62  ;;  %v3114_v62 = vld [vmem:[%s4881_s28] ss:$0 sm:$0xff] }
 0x879   : > { %v3665_v0 = vpop.eup %3664 }
 0x87a   : > { %v1313_v46 = vmul.f32 %v3665_v0, %v4477_v3  ;;  %v3571_v0 = vld [vmem:[%s4300_s23 + $0x30] ss:$8 sps:$4 sm:$0xff]  }
 0x87f   : > { %v3494_v17 = vpop.permute.xlu0 %3493 }
 0x880   : > { %v3496_v19 = vunpack.i.h.bf16 %v3494_v17  ;;  %v3495_v20 = vunpack.i.l.bf16 %v3494_v17 }
 0x882   : > { %v2107_v34 = vsel %vm1078_vm1, %v1311_v24, %v3496_v19  ;;  %v2106_v41 = vsel %vm1078_vm1, %v1310_v47, %v3495_v20 }
 0x883   : > { %v3499_v16 = vpop.permute.xlu1 %3498 }
 0x884   : > { %v3501_v60 = vunpack.i.h.bf16 %v3499_v16  ;;  %v3500_v26 = vunpack.i.l.bf16 %v3499_v16  ;;  %v3565_v16 = vld [vmem:[%s4300_s23 + $0x10] ss:$8 sps:$4 sm:$0xff]  }
 0x885   : > { %2426 = vmatpush1.bf16.msra.mxu0 %v3565_v16 }
 0x886   : > { %v2109_v32 = vsel %vm1078_vm1, %v1313_v46, %v3501_v60  ;;  %v2108_v40 = vsel %vm1078_vm1, %v1312_v4, %v3500_v26  ;;  %v3579_v60 = vld [vmem:[%s4300_s23 + $0x54] ss:$8 sps:$4 sm:$0xff]   ;;  %v3577_v26 = vld [vmem:[%s4300_s23 + $0x50] ss:$8 sps:$4 sm:$0xff]   ;;  %v3586_v4 = vld [vmem:[%s4346_s1 + $0x40] sm:$0xff]  }
 0x887   : > { %v3504_v18 = vpop.permute.xlu1 %3503  ;;  %v3583_v46 = vld [vmem:[%s4300_s23 + $0x70] ss:$8 sps:$4 sm:$0xff]   ;;  %3222 = vmatprep.subr.bf16.mxu1 %v3586_v4 }
 0x888   : > { %v3506_v21 = vunpack.i.h.bf16 %v3504_v18  ;;  %v3505_v22 = vunpack.i.l.bf16 %v3504_v18 }
 0x88a   : > { %v2111_v59 = vsel %vm2110_vm3, %v2106_v41, %v3505_v22  ;;  %v2112_v36 = vsel %vm2110_vm3, %v2107_v34, %v3506_v21 }
 0x88b   : > { %v3509_v61 = vpop.permute.xlu1 %3508 }
 0x88c   : > { %v3511_v57 = vunpack.i.h.bf16 %v3509_v61  ;;  %v3510_v1 = vunpack.i.l.bf16 %v3509_v61  ;;  %v3573_v61 = vld [vmem:[%s4300_s23 + $0x34] ss:$8 sps:$4 sm:$0xff]  }
 0x8a6   : > { %v1992_v29 = vpop.f32.mrb[28].mxu1 }
 0x8a7   : > { %v3358_v42 = vpop.f32.mrb[29].mxu1  ;;  %v2054_v49 = vmul.f32 %v3651_v38, %v1992_v29  ;;  %v2114_v29 = vsel %vm2110_vm3, %v2109_v32, %v3511_v57  ;;  %v2113_v38 = vsel %vm2110_vm3, %v2108_v40, %v3510_v1  ;;  %v3580_v57 = vld [vmem:[%s4300_s23 + $0x60] ss:$8 sps:$4 sm:$0xff]   ;;  %v3585_v1 = vld [vmem:[%s4300_s23 + $0x74] ss:$8 sps:$4 sm:$0xff]  }
 0x8a8   : > { %v1995_v48 = vpop.f32.mrb[30].mxu1  ;;  %v3588_v32 = vld [vmem:[%s4346_s1 + $0x48] sm:$0xff]  }
 0x8a9   : > { %v2055_v52 = vmul.f32 %v3653_v45, %v1995_v48  ;;  %v3359_v54 = vpop.f32.mrb[31].mxu1  ;;  %v3589_v40 = vld [vmem:[%s4346_s1 + $0x8] sm:$0xff]  }
 0x8ab   : > { %v3512_v63 = vpack.i.bf16 %v2055_v52, %v2054_v49 }
 0x8ad   : > { %3513 = vrot.lane.b32.xlu0 %v3512_v63, %s3946_s0  ;;  %v2039_v2 = vpop.f32.mrb[40].mxu0 }
 0x8ae   : > { %v3364_v8 = vpop.f32.mrb[41].mxu0  ;;  %v2056_v11 = vmul.f32 %v3655_v5, %v2039_v2  ;;  %v3682_v5 = vld [vmem:[#allocation2] sm:$0xff] }
 0x8af   : > { %v2042_v10 = vpop.f32.mrb[42].mxu0 }
 0x8b0   : > { %v2057_v43 = vmul.f32 %v3657_v9, %v2042_v10  ;;  %v3365_v12 = vpop.f32.mrb[43].mxu0  ;;  %v3683_v9 = vld [vmem:[#allocation2 + $0x8] sm:$0xff] }
 0x8b2   : > { %v3517_v13 = vpack.i.bf16 %v2057_v43, %v2056_v11  ;;  %v3684_v43 = vld [vmem:[#allocation2 + $0x10] sm:$0xff] }
 0x8b4   : > { %3518 = vrot.lane.b32.xlu1 %v3517_v13, %s3946_s0  ;;  %v3685_v13 = vld [vmem:[#allocation2 + $0x18] sm:$0xff] }
 0x91f   : > { %v3514_v25 = vpop.permute.xlu0 %3513 }
 0x920   : > { %v3516_v53 = vunpack.i.h.bf16 %v3514_v25  ;;  %v3515_v55 = vunpack.i.l.bf16 %v3514_v25 }
 0x922   : > { %v2116_v56 = vsel %vm2115_vm4, %v2111_v59, %v3515_v55  ;;  %v2117_v58 = vsel %vm2115_vm4, %v2112_v36, %v3516_v53  ;;  %v3570_v59 = vld [vmem:[%s4300_s23 + $0x24] ss:$8 sps:$4 sm:$0xff]   ;;  %v3568_v36 = vld [vmem:[%s4300_s23 + $0x20] ss:$8 sps:$4 sm:$0xff]  }
 0x923   : > { %v2120_v28 = vpack.c.bf16 %v2117_v58, %v2116_v56  ;;  %2427 = vmatprep.subr.bf16.mxu0 %v3570_v59  ;;  %v3576_v56 = vld [vmem:[%s4300_s23 + $0x44] ss:$8 sps:$4 sm:$0xff]   ;;  %v3574_v58 = vld [vmem:[%s4300_s23 + $0x40] ss:$8 sps:$4 sm:$0xff]  }
 0x924   : > { %2428 = vmatpush1.bf16.msra.mxu0 %v3568_v36  ;;  %v2331_v59 = vld [vmem:[%s4328_s22] sm:$0x3] }
 0x925   : > { %3382 = vmatprep.mubr.bf16.mxu1 %v2120_v28  ;;  %2429 = vmatprep.subr.bf16.mxu0 %v3573_v61  ;;  %v3582_v28 = vld [vmem:[%s4300_s23 + $0x64] ss:$8 sps:$4 sm:$0xff]   ;;  %v2340_v36 = vrot.slane %v2331_v59, %v835_v33 }
 0x926   : > { %v3519_v7 = vpop.permute.xlu1 %3518 }
 0x927   : > { %v3521_v35 = vunpack.i.h.bf16 %v3519_v7  ;;  %v3520_v37 = vunpack.i.l.bf16 %v3519_v7  ;;  %v3587_v7 = vld [vmem:[%s4346_s1] sm:$0xff]  }
 0x928   : > { %2430 = vmatpush1.bf16.msra.mxu0 %v3571_v0 }
 0x929   : > { %v2119_v42 = vsel %vm2115_vm4, %v2114_v29, %v3521_v35  ;;  %v2118_v39 = vsel %vm2115_vm4, %v2113_v38, %v3520_v37  ;;  %2431 = vmatprep.subr.bf16.mxu0 %v3576_v56  ;;  %v3590_v35 = vld [vmem:[%s4346_s1 + $0x50] sm:$0xff]   ;;  %v3592_v29 = vld [vmem:[%s4346_s1 + $0x58] sm:$0xff]  }
 0x92a   : > { %v2121_v45 = vpack.c.bf16 %v2119_v42, %v2118_v39  ;;  %v3591_v37 = vld [vmem:[%s4346_s1 + $0x10] sm:$0xff]   ;;  %v3593_v38 = vld [vmem:[%s4346_s1 + $0x18] sm:$0xff]   ;;  %v3594_v42 = vld [vmem:[%s4346_s1 + $0x60] sm:$0xff]  }
 0x92b   : > { %v3595_v39 = vld [vmem:[%s4346_s1 + $0x20] sm:$0xff]  }
 0x92c   : > { %3383 = vmatmul.mubr.bf16.vlgmr.msra.gmra.mrb[32].mxu1 %v2121_v45  ;;  %2432 = vmatpush1.bf16.msra.mxu0 %v3574_v58  ;;  %v3596_v45 = vld [vmem:[%s4346_s1 + $0x68] sm:$0xff]  }
 0x92d   : > { %2433 = vmatprep.subr.bf16.mxu0 %v3579_v60  ;;  %3223 = vmatpush3.bf16.msra.mxu1 %v3587_v7 }
 0x92e   : > { %3224 = vmatprep.subr.bf16.mxu1 %v3588_v32 }
 0x930   : > { %2434 = vmatpush1.bf16.msra.mxu0 %v3577_v26 }
 0x931   : > { %2435 = vmatprep.subr.bf16.mxu0 %v3582_v28  ;;  %3225 = vmatpush3.bf16.msra.mxu1 %v3589_v40 }
 0x932   : > { %3226 = vmatprep.subr.bf16.mxu1 %v3590_v35 }
 0x934   : > { %2436 = vmatpush1.bf16.msra.mxu0 %v3580_v57 }
 0x935   : > { %2437 = vmatprep.subr.bf16.mxu0 %v3585_v1  ;;  %3227 = vmatpush3.bf16.msra.mxu1 %v3591_v37 }
 0x936   : > { %3228 = vmatprep.subr.bf16.mxu1 %v3592_v29 }
 0x938   : > { %2438 = vmatpush1.bf16.msra.mxu0 %v3583_v46 }
 0x939   : > { %3229 = vmatpush3.bf16.msra.mxu1 %v3593_v38 }
 0x93a   : > { %3230 = vmatprep.subr.bf16.mxu1 %v3594_v42 }
 0x93d   : > { %3231 = vmatpush3.bf16.msra.mxu1 %v3595_v39 }
 0x93e   : > { %3232 = vmatprep.subr.bf16.mxu1 %v3596_v45 }
 0x9ff   : > { %v3384_v3 = vpop.f32.mrb[32].mxu1 }
 0xa00   : > { %v2227_v48 = vpop.f32.mrb[33].mxu1  ;;  %v2236_v63 = vadd.f32 %v3384_v3, %v3114_v62 }
 0xa01   : > { %v2228_v49 = vadd.f32 %v3114_v62, %v2227_v48  ;;  %v3385_v52 = vpop.f32.mrb[34].mxu1 }
 0xa02   : > { %v2230_v54 = vpop.f32.mrb[35].mxu1  ;;  %v2239_v11 = vadd.f32 %v3385_v52, %v3114_v62  ;;  %v2244_v12 = vadd.f32 %v3684_v43, %v2236_v63  ;;  %v3123_v43 = vld [vmem:[%s765_s13] ss:$0 sm:$0xff] }
 0xa03   : > { %v2231_v2 = vadd.f32 %v3114_v62, %v2230_v54  ;;  %v2242_v8 = vadd.f32 %v3682_v5, %v2228_v49 }
 0xa04   : > { %v2245_v27 = vadd.f32 %v3685_v13, %v2239_v11 }
 0xa05   : > { %2248 = vadd.xlane.f32.xlu0 %v2242_v8  ;;  %v2243_v10 = vadd.f32 %v3683_v9, %v2231_v2 }
 0xa07   : > { %2250 = vadd.xlane.f32.xlu1 %v2243_v10 }
 0xa09   : > { %2252 = vadd.xlane.f32.xlu0 %v2244_v12 }
 0xa0d   : > { %2254 = vadd.xlane.f32.xlu0 %v2245_v27 }
 0xa92   : > { %v2249_v17 = vpop.xlane.xlu0 %2248 }
 0xa93   : > { %v2257_v44 = vmul.f32 0.0078125, %v2249_v17 }
 0xa94   : > { %v2251_v18 = vpop.xlane.xlu1 %2250 }
 0xa95   : > { %v4656_v51 = vsub.f32 %v2242_v8, %v2257_v44  ;;  %v2258_v19 = vmul.f32 0.0078125, %v2251_v18 }
 0xa96   : > { %v2253_v20 = vpop.xlane.xlu0 %2252 }
 0xa97   : > { %v4658_v21 = vsub.f32 %v2243_v10, %v2258_v19  ;;  %v2259_v22 = vmul.f32 0.0078125, %v2253_v20  ;;  %v2265_v47 = vmul.f32 %v4656_v51, %v4656_v51 }
 0xa99   : > { %v4662_v24 = vsub.f32 %v2244_v12, %v2259_v22  ;;  %2269 = vadd.xlane.f32.xlu0 %v2265_v47  ;;  %v2266_v25 = vmul.f32 %v4658_v21, %v4658_v21 }
 0xa9a   : > { %v2255_v34 = vpop.xlane.xlu0 %2254 }
 0xa9b   : > { %v2260_v41 = vmul.f32 0.0078125, %v2255_v34  ;;  %2271 = vadd.xlane.f32.xlu1 %v2266_v25  ;;  %v2267_v53 = vmul.f32 %v4662_v24, %v4662_v24  ;;  %v3597_v34 = vld [vmem:[%s4346_s1 + $0x28] sm:$0xff]  }
 0xa9c   : > { %3233 = vmatpush3.bf16.msra.mxu1 %v3597_v34 }
 0xa9d   : > { %v4668_v55 = vsub.f32 %v2245_v27, %v2260_v41  ;;  %2273 = vadd.xlane.f32.xlu0 %v2267_v53  ;;  %v3598_v41 = vld [vmem:[%s4346_s1 + $0x70] sm:$0xff]  }
 0xa9e   : > { %v3599_v53 = vld [vmem:[%s4346_s1 + $0x30] sm:$0xff]   ;;  %3234 = vmatprep.subr.bf16.mxu1 %v3598_v41 }
 0xa9f   : > { %v2268_v23 = vmul.f32 %v4668_v55, %v4668_v55 }
 0xaa0   : > { %3235 = vmatpush3.bf16.msra.mxu1 %v3599_v53 }
 0xaa1   : > { %2275 = vadd.xlane.f32.xlu1 %v2268_v23  ;;  %v3601_v23 = vld [vmem:[%s4346_s1 + $0x38] sm:$0xff]  }
 0xb26   : > { %v2270_v62 = vpop.xlane.xlu0 %2269 }
 0xb27   : > { %v2277_v3 = vmul.f32 0.0078125, %v2270_v62 }
 0xb28   : > { %v2272_v48 = vpop.xlane.xlu1 %2271 }
 0xb29   : > { %v2281_v49 = vadd.f32 1e-05, %v2277_v3  ;;  %v2278_v52 = vmul.f32 0.0078125, %v2272_v48 }
 0xb2a   : > { %v2274_v54 = vpop.xlane.xlu0 %2273 }
 0xb2b   : > { %3666 = vrsqrt.f32 %v2281_v49  ;;  %v2282_v63 = vadd.f32 1e-05, %v2278_v52  ;;  %v2279_v2 = vmul.f32 0.0078125, %v2274_v54  ;;  %v3141_v54 = vld [vmem:[%s4884_s26] ss:$0 sm:$0xff] }
 0xb2d   : > { %3668 = vrsqrt.f32 %v2282_v63  ;;  %v2283_v5 = vadd.f32 1e-05, %v2279_v2 }
 0xb2e   : > { %v2276_v8 = vpop.xlane.xlu1 %2275 }
 0xb2f   : > { %3670 = vrsqrt.f32 %v2283_v5  ;;  %v2280_v9 = vmul.f32 0.0078125, %v2276_v8 }
 0xb31   : > { %v2284_v10 = vadd.f32 1e-05, %v2280_v9 }
 0xb33   : > { %3672 = vrsqrt.f32 %v2284_v10 }
 0xb35   : > { %v3667_v11 = vpop.eup %3666 }
 0xb36   : > { %v2289_v12 = vmul.f32 %v3667_v11, %v4656_v51 }
 0xb37   : > { %v3669_v13 = vpop.eup %3668 }
 0xb38   : > { %v2290_v27 = vmul.f32 %v3669_v13, %v4658_v21  ;;  %v2299_v14 = vmul.f32 %v3123_v43, %v2289_v12 }
 0xb39   : > { %v3671_v15 = vpop.eup %3670 }
 0xb3a   : > { %v2300_v16 = vmul.f32 %v3123_v43, %v2290_v27  ;;  %v4707_v17 = vadd.f32 %v3124_v50, %v2299_v14  ;;  %v2291_v18 = vmul.f32 %v3671_v15, %v4662_v24 }
 0xb3c   : > { %v4709_v44 = vadd.f32 %v3124_v50, %v2300_v16  ;;  %v2301_v21 = vmul.f32 %v3123_v43, %v2291_v18 }
 0xb3d   : > { %v3673_v51 = vpop.eup %3672 }
 0xb3e   : > { %v2313_v19 = vpack.c.bf16 %v4709_v44, %v4707_v17  ;;  %v2292_v20 = vmul.f32 %v3673_v51, %v4668_v55  ;;  %v4718_v25 = vadd.f32 %v3124_v50, %v2301_v21  ;;  %v3600_v55 = vld [vmem:[%s4346_s1 + $0x78] sm:$0xff]  }
 0xb3f   : > { %3236 = vmatprep.subr.bf16.mxu1 %v3600_v55 }
 0xb40   : > { %2456 = vmatmul.mubr.bf16.vlgmr.msra.gmra.mrb[44].mxu0 %v2313_v19  ;;  %v2302_v22 = vmul.f32 %v3123_v43, %v2292_v20  ;;  %3237 = vmatpush3.bf16.msra.mxu1 %v3601_v23 }
 0xb41   : > { %2465 = vmatprep.mubr.bf16.mxu0 %v3943_v6  ;;  %v2336_v6 = vrot.slane %v2331_v59, %v831_v31 }
 0xb42   : > { %v4716_v47 = vadd.f32 %v3124_v50, %v2302_v22 }
 0xb44   : > { %v2314_v24 = vpack.c.bf16 %v4716_v47, %v4718_v25 }
 0xb48   : > { %2466 = vmatmul.mubr.bf16.gmra.mrb[48].mxu0 %v2314_v24 }
 0xc13   : > { %v2457_v61 = vpop.f32.mrb[44].mxu0 }
 0xc14   : > { %v2458_v0 = vadd.f32 %v2457_v61, %v2336_v6  ;;  %v2459_v56 = vpop.f32.mrb[45].mxu0 }
 0xc15   : > { %v2460_v58 = vadd.f32 %v2459_v56, %v2340_v36  ;;  %v2461_v60 = vpop.f32.mrb[46].mxu0 }
 0xc16   : > { %v2462_v26 = vadd.f32 %v2461_v60, %v2336_v6  ;;  %v2463_v28 = vpop.f32.mrb[47].mxu0  ;;  %v2476_v1 = vmax.f32 %v2458_v0, 0.0 }
 0xc17   : > { %v2464_v57 = vadd.f32 %v2463_v28, %v2340_v36  ;;  %v2477_v4 = vmax.f32 %v2460_v58, 0.0 }
 0xc18   : > { %v2478_v46 = vmax.f32 %v2462_v26, 0.0 }
 0xc19   : > { %v2479_v7 = vmax.f32 %v2464_v57, 0.0 }
 0xc1a   : > { %v2484_v32 = vpack.c.bf16 %v2478_v46, %v2476_v1 }
 0xc1b   : > { %v2485_v40 = vpack.c.bf16 %v2479_v7, %v2477_v4  ;;  %v2467_v35 = vpop.f32.mrb[48].mxu0 }
 0xc1c   : > { %v2468_v37 = vadd.f32 %v2467_v35, %v2336_v6  ;;  %v2469_v31 = vpop.f32.mrb[49].mxu0  ;;  %v3158_v35 = vld [vmem:[%s771_s19] ss:$0 sm:$0xff] }
 0xc1d   : > { %v2470_v29 = vadd.f32 %v2469_v31, %v2340_v36  ;;  %v2471_v30 = vpop.f32.mrb[50].mxu0  ;;  %2655 = vmatprep.mubr.bf16.mxu1 %v2485_v40 }
 0xc1e   : > { %v2472_v33 = vadd.f32 %v2471_v30, %v2336_v6  ;;  %v2473_v38 = vpop.f32.mrb[51].mxu0  ;;  %2656 = vmatmul.mubr.bf16.vlgmr.msra.gmra.mrb[36].mxu1 %v2484_v32  ;;  %v2480_v39 = vmax.f32 %v2468_v37, 0.0 }
 0xc1f   : > { %v2474_v42 = vadd.f32 %v2473_v38, %v2340_v36  ;;  %v2481_v62 = vmax.f32 %v2470_v29, 0.0  ;;  %v3159_v29 = vld [vmem:[%s774_s2] ss:$0 sm:$0xff] }
 0xc20   : > { %v2482_v45 = vmax.f32 %v2472_v33, 0.0 }
 0xc21   : > { %v2483_v3 = vmax.f32 %v2474_v42, 0.0 }
 0xc22   : > { %v2486_v48 = vpack.c.bf16 %v2482_v45, %v2480_v39 }
 0xc23   : > { %v2487_v49 = vpack.c.bf16 %v2483_v3, %v2481_v62 }
 0xc25   : > { %2663 = vmatprep.mubr.bf16.mxu1 %v2487_v49 }
 0xc26   : > { %2664 = vmatmul.mubr.bf16.gmra.mrb[40].mxu1 %v2486_v48 }
 0xcf1   : > { %v3238_v52 = vpop.f32.mrb[36].mxu1 }
 0xcf2   : > { %v3239_v63 = vpop.f32.mrb[37].mxu1 }
 0xcf3   : > { %v3240_v2 = vadd.f32 %v3239_v63, %v3238_v52  ;;  %v3241_v5 = vpop.f32.mrb[38].mxu1 }
 0xcf4   : > { %v3242_v8 = vpop.f32.mrb[39].mxu1 }
 0xcf5   : > { %v2658_v9 = vadd.f32 %v3240_v2, %v3141_v54  ;;  %v3243_v10 = vadd.f32 %v3242_v8, %v3241_v5 }
 0xcf7   : > { %v2661_v11 = vadd.f32 %v3243_v10, %v3141_v54  ;;  %v2672_v43 = vadd.f32 %v2658_v9, %v4707_v17 }
 0xcf9   : > { %v3244_v12 = vpop.f32.mrb[40].mxu1  ;;  %2678 = vadd.xlane.f32.xlu0 %v2672_v43  ;;  %v2673_v13 = vadd.f32 %v2661_v11, %v4709_v44 }
 0xcfa   : > { %v3245_v27 = vpop.f32.mrb[41].mxu1 }
 0xcfb   : > { %v3246_v14 = vadd.f32 %v3245_v27, %v3244_v12  ;;  %v3247_v15 = vpop.f32.mrb[42].mxu1  ;;  %2680 = vadd.xlane.f32.xlu1 %v2673_v13 }
 0xcfc   : > { %v3248_v50 = vpop.f32.mrb[43].mxu1 }
 0xcfd   : > { %v2666_v16 = vadd.f32 %v3246_v14, %v3141_v54  ;;  %v3249_v18 = vadd.f32 %v3248_v50, %v3247_v15 }
 0xcff   : > { %v2669_v51 = vadd.f32 %v3249_v18, %v3141_v54  ;;  %v2674_v19 = vadd.f32 %v2666_v16, %v4718_v25 }
 0xd01   : > { %2682 = vadd.xlane.f32.xlu0 %v2674_v19  ;;  %v2675_v20 = vadd.f32 %v2669_v51, %v4716_v47 }
 0xd03   : > { %2684 = vadd.xlane.f32.xlu1 %v2675_v20 }
 0xd86   : > { %v2679_v21 = vpop.xlane.xlu0 %2678 }
 0xd87   : > { %v2686_v17 = vmul.f32 0.0078125, %v2679_v21 }
 0xd88   : > { %v2681_v22 = vpop.xlane.xlu1 %2680 }
 0xd89   : > { %v2690_v24 = vsub.f32 %v2672_v43, %v2686_v17  ;;  %v2687_v34 = vmul.f32 0.0078125, %v2681_v22 }
 0xd8b   : > { %v2691_v44 = vsub.f32 %v2673_v13, %v2687_v34  ;;  %v2694_v41 = vmul.f32 %v2690_v24, %v2690_v24 }
 0xd8d   : > { %2698 = vadd.xlane.f32.xlu0 %v2694_v41  ;;  %v2695_v53 = vmul.f32 %v2691_v44, %v2691_v44 }
 0xd8e   : > { %v2683_v55 = vpop.xlane.xlu0 %2682 }
 0xd8f   : > { %v2688_v23 = vmul.f32 0.0078125, %v2683_v55  ;;  %2700 = vadd.xlane.f32.xlu1 %v2695_v53 }
 0xd90   : > { %v2685_v59 = vpop.xlane.xlu1 %2684 }
 0xd91   : > { %v2692_v6 = vsub.f32 %v2674_v19, %v2688_v23  ;;  %v2689_v36 = vmul.f32 0.0078125, %v2685_v59 }
 0xd93   : > { %v2693_v25 = vsub.f32 %v2675_v20, %v2689_v36  ;;  %v2696_v61 = vmul.f32 %v2692_v6, %v2692_v6 }
 0xd95   : > { %2702 = vadd.xlane.f32.xlu0 %v2696_v61  ;;  %v2697_v47 = vmul.f32 %v2693_v25, %v2693_v25 }
 0xd97   : > { %2704 = vadd.xlane.f32.xlu1 %v2697_v47  ;;  %v3161_v47 = vld [vmem:[%s4887_s21] ss:$0 sm:$0xff] (!%p3160_p11) }
 0xe1a   : > { %v2699_v0 = vpop.xlane.xlu0 %2698 }
 0xe1b   : > { %v2706_v56 = vmul.f32 0.0078125, %v2699_v0 }
 0xe1c   : > { %v2701_v58 = vpop.xlane.xlu1 %2700 }
 0xe1d   : > { %v2710_v60 = vadd.f32 1e-05, %v2706_v56  ;;  %v2707_v26 = vmul.f32 0.0078125, %v2701_v58  ;;  %v3162_v56 = vld [vmem:[%s4888_s30] ss:$0 sm:$0xff] (!%p3160_p11) }
 0xe1f   : > { %3674 = vrsqrt.f32 %v2710_v60  ;;  %v2711_v28 = vadd.f32 1e-05, %v2707_v26 }
 0xe21   : > { %3676 = vrsqrt.f32 %v2711_v28 }
 0xe22   : > { %v2703_v57 = vpop.xlane.xlu0 %2702 }
 0xe23   : > { %v2708_v1 = vmul.f32 0.0078125, %v2703_v57 }
 0xe24   : > { %v2705_v46 = vpop.xlane.xlu1 %2704 }
 0xe25   : > { %v2712_v4 = vadd.f32 1e-05, %v2708_v1  ;;  %v2709_v7 = vmul.f32 0.0078125, %v2705_v46 }
 0xe27   : > { %3678 = vrsqrt.f32 %v2712_v4  ;;  %v2713_v32 = vadd.f32 1e-05, %v2709_v7 }
 0xe29   : > { %v3675_v40 = vpop.eup %3674  ;;  %3680 = vrsqrt.f32 %v2713_v32 }
 0xe2a   : > { %v2718_v37 = vmul.f32 %v3675_v40, %v2690_v24 }
 0xe2b   : > { %v3677_v31 = vpop.eup %3676 }
 0xe2c   : > { %v2728_v30 = vmul.f32 %v3158_v35, %v2718_v37  ;;  %v2719_v33 = vmul.f32 %v3677_v31, %v2691_v44 }
 0xe2e   : > { %v2738_v38 = vadd.f32 %v3159_v29, %v2728_v30  ;;  %v2729_v42 = vmul.f32 %v3158_v35, %v2719_v33 }
 0xe30   : > { %2742 = vst [vmem:[#allocation2] sm:$0xff] %v2738_v38  ;;  %v2739_v39 = vadd.f32 %v3159_v29, %v2729_v42 }
 0xe31   : > { %v3679_v45 = vpop.eup %3678 }
 0xe32   : > { %2743 = vst [vmem:[#allocation2 + $0x8] sm:$0xff] %v2739_v39  ;;  %v2720_v62 = vmul.f32 %v3679_v45, %v2692_v6 }
 0xe33   : > { %v3681_v3 = vpop.eup %3680 }
 0xe34   : > { %v2730_v48 = vmul.f32 %v3158_v35, %v2720_v62  ;;  %v2721_v49 = vmul.f32 %v3681_v3, %v2693_v25  ;;  %2749 = sbr.rel (%p3160_p11) target bundleno = 3964 (0xf7c), region = 108 }
 0xe36   : > { %v2740_v52 = vadd.f32 %v3159_v29, %v2730_v48  ;;  %v2731_v54 = vmul.f32 %v3158_v35, %v2721_v49 }
 0xe37   : > { %v2750_v2 = vld [vmem:[#allocation2] sm:$0xff] (!%p3160_p11) }
 0xe38   : > { %2744 = vst [vmem:[#allocation2 + $0x10] sm:$0xff] %v2740_v52  ;;  %v2741_v63 = vadd.f32 %v3159_v29, %v2731_v54  ;;  %2756 = vadd.xlane.f32.xlu0 (!%p3160_p11), %v2750_v2 }
 0xe39   : > { %v2751_v8 = vld [vmem:[#allocation2 + $0x8] sm:$0xff] (!%p3160_p11) }
 0xe3a   : > { %2745 = vst [vmem:[#allocation2 + $0x18] sm:$0xff] %v2741_v63 }
 0xe3c   : > { %2758 = vadd.xlane.f32.xlu0 %v2751_v8 }
 0xe3f   : > { %v2752_v5 = vld [vmem:[#allocation2 + $0x10] sm:$0xff] }
 0xe40   : > { %2760 = vadd.xlane.f32.xlu1 %v2752_v5 }
 0xe41   : > { %v2753_v9 = vld [vmem:[#allocation2 + $0x18] sm:$0xff] }
 0xe44   : > { %2762 = vadd.xlane.f32.xlu1 %v2753_v9 }
 0xec5   : > { %v2757_v10 = vpop.xlane.xlu0 %2756 }
 0xec6   : > { %v2764_v43 = vmul.f32 0.0078125, %v2757_v10 }
 0xec8   : > { %v2768_v13 = vsub.f32 %v2750_v2, %v2764_v43 }
 0xec9   : > { %v2759_v14 = vpop.xlane.xlu0 %2758 }
 0xeca   : > { %v2765_v50 = vmul.f32 0.0078125, %v2759_v14  ;;  %v2772_v16 = vmul.f32 %v2768_v13, %v2768_v13 }
 0xecc   : > { %v2769_v51 = vsub.f32 %v2751_v8, %v2765_v50  ;;  %2776 = vadd.xlane.f32.xlu0 %v2772_v16 }
 0xecd   : > { %v2761_v11 = vpop.xlane.xlu1 %2760 }
 0xece   : > { %v2766_v12 = vmul.f32 0.0078125, %v2761_v11  ;;  %v2773_v21 = vmul.f32 %v2769_v51, %v2769_v51 }
 0xed0   : > { %v2770_v27 = vsub.f32 %v2752_v5, %v2766_v12  ;;  %2778 = vadd.xlane.f32.xlu1 %v2773_v21 }
 0xed1   : > { %v2763_v15 = vpop.xlane.xlu1 %2762 }
 0xed2   : > { %v2767_v18 = vmul.f32 0.0078125, %v2763_v15  ;;  %v2774_v20 = vmul.f32 %v2770_v27, %v2770_v27 }
 0xed4   : > { %v2771_v19 = vsub.f32 %v2753_v9, %v2767_v18  ;;  %2780 = vadd.xlane.f32.xlu0 %v2774_v20 }
 0xed6   : > { %v2775_v17 = vmul.f32 %v2771_v19, %v2771_v19 }
 0xed8   : > { %2782 = vadd.xlane.f32.xlu1 %v2775_v17 }
 0xf59   : > { %v2777_v22 = vpop.xlane.xlu0 %2776 }
 0xf5a   : > { %v2784_v24 = vmul.f32 0.0078125, %v2777_v22 }
 0xf5c   : > { %v2788_v34 = vadd.f32 1e-05, %v2784_v24 }
 0xf5d   : > { %v2779_v44 = vpop.xlane.xlu1 %2778 }
 0xf5e   : > { %3686 = vrsqrt.f32 %v2788_v34  ;;  %v2785_v53 = vmul.f32 0.0078125, %v2779_v44 }
 0xf60   : > { %v2789_v23 = vadd.f32 1e-05, %v2785_v53 }
 0xf61   : > { %v2781_v41 = vpop.xlane.xlu0 %2780 }
 0xf62   : > { %v2786_v55 = vmul.f32 0.0078125, %v2781_v41  ;;  %3688 = vrsqrt.f32 %v2789_v23 }
 0xf64   : > { %v2790_v59 = vadd.f32 1e-05, %v2786_v55 }
 0xf65   : > { %v2783_v6 = vpop.xlane.xlu1 %2782 }
 0xf66   : > { %v2787_v36 = vmul.f32 0.0078125, %v2783_v6  ;;  %3690 = vrsqrt.f32 %v2790_v59 }
 0xf68   : > { %v2791_v25 = vadd.f32 1e-05, %v2787_v36  ;;  %v3687_v61 = vpop.eup %3686 }
 0xf69   : > { %v2796_v0 = vmul.f32 %v3687_v61, %v2768_v13 }
 0xf6a   : > { %3692 = vrsqrt.f32 %v2791_v25 }
 0xf6b   : > { %v2806_v58 = vmul.f32 %v3161_v47, %v2796_v0 }
 0xf6c   : > { %v3689_v60 = vpop.eup %3688 }
 0xf6d   : > { %v2816_v28 = vadd.f32 %v3162_v56, %v2806_v58  ;;  %v2797_v57 = vmul.f32 %v3689_v60, %v2769_v51 }
 0xf6f   : > { %2820 = vst [vmem:[#allocation12] sm:$0xff] %v2816_v28  ;;  %v2807_v46 = vmul.f32 %v3161_v47, %v2797_v57 }
 0xf70   : > { %v3691_v26 = vpop.eup %3690 }
 0xf71   : > { %v2798_v1 = vmul.f32 %v3691_v26, %v2770_v27  ;;  %v2817_v32 = vadd.f32 %v3162_v56, %v2807_v46 }
 0xf73   : > { %v2808_v7 = vmul.f32 %v3161_v47, %v2798_v1  ;;  %2821 = vst [vmem:[#allocation12 + $0x8] sm:$0xff] %v2817_v32 }
 0xf74   : > { %v3693_v4 = vpop.eup %3692 }
 0xf75   : > { %v2799_v40 = vmul.f32 %v3693_v4, %v2771_v19  ;;  %v2818_v35 = vadd.f32 %v3162_v56, %v2808_v7 }
 0xf77   : > { %v2809_v37 = vmul.f32 %v3161_v47, %v2799_v40  ;;  %2822 = vst [vmem:[#allocation12 + $0x10] sm:$0xff] %v2818_v35 }
 0xf79   : > { %v2819_v31 = vadd.f32 %v3162_v56, %v2809_v37 }
 0xf7b   : > { %2823 = vst [vmem:[#allocation12 + $0x18] sm:$0xff] %v2819_v31 }
 0xf7c PF: > { %s4889_s18 = sld [smem:[#allocation23_spill]]  ;;  %s3949_s16 = smov [#allocation12]  }
 0xf7d   : > { %s2834_s0 = sshll.u32 %s3949_s16, 4  ;;  %s2835_s0 = int_to_ptr.vmem [resolvable:$true] %s2834_s0 }
 0xf7e   : > { %s3842_s3 = scalar_lea.vmem %s2835_s0, 512  ;;  %p3849_p13 = scmp.lt.s32.totalorder %s2835_s0, %s2835_s0 }
 0xf7f   : > { %p3843_p6 = scmp.ne.s32.totalorder %s2835_s0, %s3842_s3  ;;  %p3850_p2 = scmp.lt.s32.totalorder %s3842_s3, %s3842_s3 }
 0xf81   : > { %p3851_p0 = por %p3850_p2, %p3849_p13 }
 0xf82   : > { %p3426_p10 = scmp.eq.s32.totalorder %s4889_s18, 1 }
 0xf84   : > { %p3844_p3 = pnand %p3843_p6, %p3426_p10 }
 0xf86   : > { %p3845_p9 = pneg %p3844_p3 }
 0xf88   : > { %p3852_p7 = pnand %p3851_p0, %p3845_p9 }
 0xf8a   : > { %3855 = shalt.err (!%p3852_p7)
}
 0xf8b   : > { %s4890_s25 = sld [smem:[#allocation37_spill]] }
 0xf91   : > { %s3856_s28 = scalar_lea.hbm %s4890_s25, 512 }
 0xf92   : > { %p3857_p1 = scmp.ne.s32.totalorder %s4890_s25, %s3856_s28  ;;  %p3862_p8 = scmp.lt.u32.totalorder %s3856_s28, %s4890_s25 }
 0xf94   : > { %p3858_p12 = pnand %p3857_p1, %p3426_p10 }
 0xf96   : > { %p3859_p4 = pneg %p3858_p12 }
 0xf98   : > { %p3864_p5 = pnand %p3862_p8, %p3859_p4 }
 0xf9a   : > { %3867 = shalt.err (!%p3864_p5)
}
 0xf9b   : > { %s3950_s24 = smov 128   ;;  %s3951_s15 = smov 8  }
 0xf9c   : > { %3403 = dma.vmem_to_hbm [thread:$0]  (%p3426_p10), %s2835_s0, 512, %s4890_s25, [#allocation5], %s3950_s24, %s3950_s24, %s3951_s15  }
 0xf9d   : > { %3905 = dma.done.wait (%p3426_p10), [#allocation5], 512  }
 0xf9e   : > { %3907 = vsyncadd (%p3426_p10), [#allocation5], 4294966784 }
 0xf9f PF: > { %s4891_s26 = sld [smem:[#allocation20_spill]]  ;;  %s4892_s18 = sld [smem:[#allocation17_spill]] }
 0xfa0   : > { %s4893_s19 = sld [smem:[#allocation18_spill]]  ;;  %s4894_s20 = sld [smem:[#allocation22_spill]] }
 0xfa1   : > { %s4895_s21 = sld [smem:[#allocation19_spill]]  ;;  %s4896_s22 = sld [smem:[#allocation21_spill]] }
 0xfa5   : > { %s33_s23 = sadd.s32 1, %s4891_s26  }
 0xfa6   : > { %p30_p11 = scmp.ge.s32.totalorder %s33_s23, 4  }
 0xfa8   :  { %32 = sbr.rel (!%p30_p11) target bundleno = 23 (0x17), region = 191 }
 0xfaf   :  { %2850 = vsyncpa [#allocation4], 1 }
 0xfb0   :  { %2852 = vsyncpa [#allocation4 + $0x1], 1 }
 0xfb1   :  { %2853 = vsyncpa [#allocation7], 1 }
 0xfb2   :  { %2855 = vsyncpa [#allocation7 + $0x1], 1 }
 0xfb3   :  { %2856 = vsyncpa [#allocation10], 1 }
 0xfb4   :  { %2858 = vsyncpa [#allocation10 + $0x1], 1 }
 0xfb5   :  { %2859 = vsyncpa [#allocation5], 1 }
 0xfb6   :  { %2861 = vsyncpa [#allocation5 + $0x1], 1 }

</bundles_post_ra>
